<compile_context>
chip_gen: v7x
topology: tpu7x:2x2x1
jax: 0.10.0
libtpu: 0.0.40
codegen_flags: <defaults>
</compile_context>

<pallas_src>
import functools
import numpy as np
import jax
import jax.numpy as jnp
from jax.experimental import pallas as pl
from jax.experimental.pallas import tpu as pltpu


def _round_up(x, m):
    return (x + m - 1) // m * m


# Gate re-ordering: PyTorch column order is [i | f | g | o]; we place them as
# [i | f | o | g] so the sigmoid gates form one contiguous 3*Hp slab.
_GATE_PERM = (0, 1, 3, 2)   # dest block d takes source block _GATE_PERM[d]


def _pad_gate_blocks(mat, H, Hp, pad_rows_to=None):
    """mat: (R, 4*H) -> (pad_rows_to or R, 4*Hp); gate blocks Hp-aligned, permuted."""
    rows = mat.shape[0]
    out_rows = pad_rows_to if pad_rows_to is not None else rows
    out = jnp.zeros((out_rows, 4 * Hp), mat.dtype)
    for d, s in enumerate(_GATE_PERM):
        out = out.at[:rows, d * Hp:d * Hp + H].set(mat[:, s * H:(s + 1) * H])
    return out


# ---------------------------------------------------------------------------
# Pallas kernel: one grid step == one chunk of Tc timesteps.  h/c live in VMEM
# scratch and persist across grid iterations (sequential time recurrence).
# ---------------------------------------------------------------------------
def _lstm_chunk_kernel(gx_ref, lens_ref, w_hh_ref,
                       out_ref, hn_ref, cn_ref,
                       h_scr, c_scr, *, tc, hp, full_unroll):
    chunk = pl.program_id(0)

    @pl.when(chunk == 0)
    def _():
        # hidden=None in the PyTorch forward -> zero initial state
        h_scr[...] = jnp.zeros_like(h_scr)
        c_scr[...] = jnp.zeros_like(c_scr)

    h0 = h_scr[...]                      # (Bp, Hp) f32
    c0 = c_scr[...]                      # (Bp, Hp) f32
    w_hh = w_hh_ref[...]                 # (Hp, 4*Hp) bf16, resident across grid
    lens = lens_ref[...]                 # (Bp, 1)  int32, resident across grid
    t_base = chunk * tc

    def step(t, h, c):
        # gx already contains x @ W_ih^T + b_ih + b_hh (bf16); upcast and add
        # the recurrent projection (bf16 matmul, f32 accumulate).
        gates = gx_ref[t].astype(jnp.float32) + jnp.dot(
            h.astype(w_hh.dtype), w_hh, preferred_element_type=jnp.float32)
        sig = jax.nn.sigmoid(gates[:, :3 * hp])       # [i | f | o] in one slab
        i_g = sig[:, 0 * hp:1 * hp]
        f_g = sig[:, 1 * hp:2 * hp]
        o_g = sig[:, 2 * hp:3 * hp]
        g_g = jnp.tanh(gates[:, 3 * hp:4 * hp])

        c_new = f_g * c + i_g * g_g
        h_new = o_g * jnp.tanh(c_new)

        # packed-sequence masking: frozen state + zero output past seq length
        m = (t_base + t) < lens                        # (Bp, 1) bool
        out_ref[t] = jnp.where(m, h_new, 0.0).astype(out_ref.dtype)
        return jnp.where(m, h_new, h), jnp.where(m, c_new, c)

    if full_unroll:
        h, c = h0, c0
        for t in range(tc):               # static unroll: LLO visibility
            h, c = step(t, h, c)
    else:
        def body(t, carry):
            return step(t, carry[0], carry[1])
        h, c = jax.lax.fori_loop(0, tc, body, (h0, c0), unroll=4)

    h_scr[...] = h
    c_scr[...] = c

    # final states are only materialized once, on the last chunk
    @pl.when(chunk == pl.num_programs(0) - 1)
    def _():
        hn_ref[...] = h
        cn_ref[...] = c


def _lstm_pallas(gx, lens_p, w_hh_p, tc, full_unroll):
    """gx: (T_pad, Bp, 4*Hp) bf16, lens_p: (Bp, 1) i32, w_hh_p: (Hp, 4*Hp) bf16."""
    T_pad, Bp, G = gx.shape
    Hp = G // 4
    n_chunks = T_pad // tc

    # Right-sized VMEM budget from actual tiled footprints (+ headroom).
    bytes_gx = 2 * tc * Bp * G * 2          # double-buffered bf16 gx blocks
    bytes_out = 2 * tc * Bp * Hp * 2        # double-buffered bf16 output blocks
    bytes_lens = 2 * 8 * 128 * 4            # (Bp,1) tiles to one (8,128) word tile
    bytes_whh = 2 * Hp * G * 2              # resident weights
    bytes_hn = 2 * 2 * Bp * Hp * 4          # hn + cn output blocks
    bytes_scr = 2 * Bp * Hp * 4             # h/c scratch
    footprint = bytes_gx + bytes_out + bytes_lens + bytes_whh + bytes_hn + bytes_scr
    vmem_limit = int(np.clip(footprint + 4 * 2**20, 8 * 2**20, 32 * 2**20))

    kernel = functools.partial(_lstm_chunk_kernel, tc=tc, hp=Hp,
                               full_unroll=full_unroll)

    out_shapes = (
        jax.ShapeDtypeStruct((T_pad, Bp, Hp), jnp.bfloat16),  # per-step outputs
        jax.ShapeDtypeStruct((Bp, Hp), jnp.float32),          # h_n
        jax.ShapeDtypeStruct((Bp, Hp), jnp.float32),          # c_n
    )
    return pl.pallas_call(
        kernel,
        out_shape=out_shapes,
        grid=(n_chunks,),
        in_specs=[
            pl.BlockSpec((tc, Bp, G), lambda c: (c, 0, 0)),   # precomputed gates_x
            pl.BlockSpec((Bp, 1), lambda c: (0, 0)),          # seq lengths (resident)
            pl.BlockSpec((Hp, G), lambda c: (0, 0)),          # W_hh^T (resident)
        ],
        out_specs=(
            pl.BlockSpec((tc, Bp, Hp), lambda c: (c, 0, 0)),
            pl.BlockSpec((Bp, Hp), lambda c: (0, 0)),
            pl.BlockSpec((Bp, Hp), lambda c: (0, 0)),
        ),
        scratch_shapes=[
            pltpu.VMEM((Bp, Hp), jnp.float32),   # h state
            pltpu.VMEM((Bp, Hp), jnp.float32),   # c state
        ],
        compiler_params=pltpu.CompilerParams(
            dimension_semantics=("arbitrary",),   # time recurrence: sequential
            vmem_limit_bytes=vmem_limit),
    )(gx, lens_p, w_hh_p)


# ---------------------------------------------------------------------------
# EncoderRNN forward (glue in plain JAX, hot LSTM recurrence in Pallas)
# ---------------------------------------------------------------------------
def encoder_rnn_forward(params, seq_tensor, seq_lengths, time_chunk=32):
    """seq_tensor: (B, T) int32, seq_lengths: (B,) int32 (sorted descending)."""
    emb_tbl = params["embedding"]          # (V, H) f32
    w_ih_t = params["w_ih_t"]              # (H, 4H) f32
    w_hh_t = params["w_hh_t"]              # (H, 4H) f32
    bias = params["bias"]                  # (1, 4H) f32  (b_ih + b_hh)

    H = emb_tbl.shape[1]
    B, T = seq_tensor.shape

    # lane-dense padding: last dim -> multiple of 128, batch -> multiple of 8
    Hp = _round_up(H, 128)
    Bp = _round_up(B, 8)
    tc = min(time_chunk, T)
    T_pad = _round_up(T, tc)

    # gate-block-aligned, zero-padded weights; matmuls in bf16 (f32 accumulate)
    w_ih_p = _pad_gate_blocks(w_ih_t, H, Hp, pad_rows_to=Hp).astype(jnp.bfloat16)
    w_hh_p = _pad_gate_blocks(w_hh_t, H, Hp, pad_rows_to=Hp).astype(jnp.bfloat16)
    bias_p = _pad_gate_blocks(bias, H, Hp)                       # (1, 4Hp) f32

    # bf16 embedding gather, time-major directly (no padded f32 intermediate).
    emb_bf = emb_tbl.astype(jnp.bfloat16)
    emb_tm = jnp.take(emb_bf, seq_tensor.T, axis=0)              # (T, B, H) bf16
    x = jnp.pad(emb_tm, ((0, T_pad - T), (0, Bp - B), (0, Hp - H)))

    # Hoisted input projection over all timesteps; stored bf16 for the kernel.
    gx = (jnp.dot(x.reshape(T_pad * Bp, Hp), w_ih_p,
                  preferred_element_type=jnp.float32) + bias_p)
    gx = gx.reshape(T_pad, Bp, 4 * Hp).astype(jnp.bfloat16)

    # seq lengths as one small resident block (padded rows stay masked forever).
    lens_p = jnp.zeros((Bp, 1), jnp.int32).at[:B, 0].set(
        seq_lengths.astype(jnp.int32))

    # full unroll only while vreg pressure is modest; otherwise partial unroll
    full_unroll = (tc * max(Hp // 128, 1)) <= 64

    outs_tm, h_n_p, c_n_p = _lstm_pallas(gx, lens_p, w_hh_p, tc, full_unroll)

    # pad_packed_sequence truncates to the longest sequence in the batch.
    # (host value; lengths are concrete in this module's usage)
    max_len = int(np.max(np.asarray(seq_lengths)))
    outputs = jnp.transpose(
        outs_tm[:max_len, :B, :H].astype(jnp.float32), (1, 0, 2))  # (B, L, H)
    hidden = (h_n_p[:B, :H][None], c_n_p[:B, :H][None])            # (1, B, H)
    return outputs, hidden


# ---------------------------------------------------------------------------
# Pure-JAX reference (lax.scan, unpadded) for a correctness check.  Uses the
# same bf16-matmul / f32-elementwise recipe as the kernel.
# ---------------------------------------------------------------------------
def _reference_forward(params, seq_tensor, seq_lengths):
    emb = jnp.take(params["embedding"], seq_tensor, axis=0)   # (B, T, H)
    B, T, H = emb.shape
    w_ih = params["w_ih_t"].astype(jnp.bfloat16)
    w_hh = params["w_hh_t"].astype(jnp.bfloat16)
    bias = params["bias"]
    lens = seq_lengths.astype(jnp.int32)

    def step(carry, xs):
        h, c = carry
        x_t, t = xs
        gates = (jnp.dot(x_t.astype(jnp.bfloat16), w_ih,
                         preferred_element_type=jnp.float32)
                 + jnp.dot(h.astype(jnp.bfloat16), w_hh,
                           preferred_element_type=jnp.float32)
                 + bias)
        i = jax.nn.sigmoid(gates[:, :H])
        f = jax.nn.sigmoid(gates[:, H:2 * H])
        g = jnp.tanh(gates[:, 2 * H:3 * H])
        o = jax.nn.sigmoid(gates[:, 3 * H:])
        c_new = f * c + i * g
        h_new = o * jnp.tanh(c_new)
        m = (lens > t)[:, None]
        c_u = jnp.where(m, c_new, c)
        h_u = jnp.where(m, h_new, h)
        out = jnp.where(m, h_new, 0.0)
        return (h_u, c_u), out

    init = (jnp.zeros((B, H), jnp.float32), jnp.zeros((B, H), jnp.float32))
    (h_n, c_n), outs = jax.lax.scan(
        step, init, (jnp.transpose(emb, (1, 0, 2)).astype(jnp.float32),
                     jnp.arange(T)))
    outputs = jnp.transpose(outs, (1, 0, 2))
    max_len = int(np.max(np.asarray(seq_lengths)))
    return outputs[:, :max_len, :], (h_n[None], c_n[None])


# ---------------------------------------------------------------------------
def init_params(key, input_size, hidden_size):
    H = hidden_size
    k = 1.0 / np.sqrt(H)
    ks = jax.random.split(key, 6)
    emb = jax.random.normal(ks[0], (input_size, H), jnp.float32)
    w_ih = jax.random.uniform(ks[1], (4 * H, H), jnp.float32, -k, k)
    w_hh = jax.random.uniform(ks[2], (4 * H, H), jnp.float32, -k, k)
    b_ih = jax.random.uniform(ks[3], (4 * H,), jnp.float32, -k, k)
    b_hh = jax.random.uniform(ks[4], (4 * H,), jnp.float32, -k, k)
    return {
        "embedding": emb,
        "w_ih_t": w_ih.T,                      # (H, 4H), PyTorch gate order [i,f,g,o]
        "w_hh_t": w_hh.T,                      # (H, 4H)
        "bias": (b_ih + b_hh).reshape(1, -1),  # (1, 4H)
    }


if __name__ == "__main__":
    input_size = 50     # vocab
    hidden_size = 32
    B, T = 2, 8

    key = jax.random.PRNGKey(0)
    params = init_params(key, input_size, hidden_size)

    seq_tensor = jax.random.randint(
        jax.random.PRNGKey(1), (B, T), 0, input_size, dtype=jnp.int32)
    # pack_padded_sequence(enforce_sorted=True) expects descending lengths
    seq_lengths = jnp.array([8, 5], dtype=jnp.int32)

    outputs, (h_n, c_n) = encoder_rnn_forward(params, seq_tensor, seq_lengths)
    jax.block_until_ready((outputs, h_n, c_n))

    ref_out, (ref_h, ref_c) = _reference_forward(params, seq_tensor, seq_lengths)
    np.testing.assert_allclose(np.asarray(outputs), np.asarray(ref_out),
                               rtol=1e-2, atol=1e-2)
    np.testing.assert_allclose(np.asarray(h_n), np.asarray(ref_h),
                               rtol=1e-2, atol=1e-2)
    np.testing.assert_allclose(np.asarray(c_n), np.asarray(ref_c),
                               rtol=1e-2, atol=1e-2)

    # TODO(synk): LSTM dropout is a no-op for n_layers == 1; bidirectional path
    # (sum of directions) not implemented since the module default is False.
    print("KERNEL_OK")
</pallas_src>

<mosaic_0001>
module attributes {stable_mosaic.version = 11 : i64} {
  func.func @_lstm_chunk_kernel(%arg0: i32, %arg1: memref<8x8x512xbf16, #tpu.memory_space<vmem>>, %arg2: memref<8x1xi32, #tpu.memory_space<vmem>>, %arg3: memref<128x512xbf16, #tpu.memory_space<vmem>>, %arg4: memref<8x8x128xbf16, #tpu.memory_space<vmem>>, %arg5: memref<8x128xf32, #tpu.memory_space<vmem>>, %arg6: memref<8x128xf32, #tpu.memory_space<vmem>>, %arg7: memref<8x128xf32, #tpu.memory_space<vmem>>, %arg8: memref<8x128xf32, #tpu.memory_space<vmem>>) attributes {dimension_semantics = [#tpu.dimension_semantics<arbitrary>], iteration_bounds = array<i64: 1>, scalar_prefetch = 0 : i64, scratch_operands = 2 : i64, tpu.core_type = #tpu.core_type<tc>, window_params = [{transform_indices = @transform_0, window_bounds = array<i64: 8, 8, 512>}, {pipeline_mode = #tpu.pipeline_mode<synchronous>, transform_indices = @transform_1, window_bounds = array<i64: 8, 1>}, {pipeline_mode = #tpu.pipeline_mode<synchronous>, transform_indices = @transform_2, window_bounds = array<i64: 128, 512>}, {transform_indices = @transform_3, window_bounds = array<i64: 8, 8, 128>}, {pipeline_mode = #tpu.pipeline_mode<synchronous>, transform_indices = @transform_4, window_bounds = array<i64: 8, 128>}, {pipeline_mode = #tpu.pipeline_mode<synchronous>, transform_indices = @transform_5, window_bounds = array<i64: 8, 128>}]} {
    %c0_i32 = arith.constant 0 : i32
    %0 = arith.cmpi eq, %arg0, %c0_i32 : i32
    %1 = arith.extui %0 : i1 to i32
    %c0_i32_0 = arith.constant 0 : i32
    %2 = arith.cmpi ne, %1, %c0_i32_0 : i32
    scf.if %2 {
      %cst_79 = arith.constant 0.000000e+00 : f32
      %325 = vector.broadcast %cst_79 : f32 to vector<8x128xf32>
      %c0_80 = arith.constant 0 : index
      %c0_81 = arith.constant 0 : index
      %326 = vector.load %arg7[%c0_80, %c0_81] : memref<8x128xf32, #tpu.memory_space<vmem>>, vector<8x128xf32>
      tpu.vector_store %arg7[%c0_80, %c0_81], %325 {strides = array<i32>} : memref<8x128xf32, #tpu.memory_space<vmem>>, vector<8x128xf32>,
      %cst_82 = arith.constant 0.000000e+00 : f32
      %327 = vector.broadcast %cst_82 : f32 to vector<8x128xf32>
      %c0_83 = arith.constant 0 : index
      %c0_84 = arith.constant 0 : index
      %328 = vector.load %arg8[%c0_83, %c0_84] : memref<8x128xf32, #tpu.memory_space<vmem>>, vector<8x128xf32>
      tpu.vector_store %arg8[%c0_83, %c0_84], %327 {strides = array<i32>} : memref<8x128xf32, #tpu.memory_space<vmem>>, vector<8x128xf32>,
    } else {
    }
    %c0 = arith.constant 0 : index
    %c0_1 = arith.constant 0 : index
    %3 = vector.load %arg7[%c0, %c0_1] : memref<8x128xf32, #tpu.memory_space<vmem>>, vector<8x128xf32>
    %c0_2 = arith.constant 0 : index
    %c0_3 = arith.constant 0 : index
    %4 = vector.load %arg8[%c0_2, %c0_3] : memref<8x128xf32, #tpu.memory_space<vmem>>, vector<8x128xf32>
    %c0_4 = arith.constant 0 : index
    %c0_5 = arith.constant 0 : index
    %5 = vector.load %arg3[%c0_4, %c0_5] : memref<128x512xbf16, #tpu.memory_space<vmem>>, vector<128x512xbf16>
    %c0_6 = arith.constant 0 : index
    %c0_7 = arith.constant 0 : index
    %6 = vector.load %arg2[%c0_6, %c0_7] : memref<8x1xi32, #tpu.memory_space<vmem>>, vector<8x1xi32>
    %c8_i32 = arith.constant 8 : i32
    %7 = arith.muli %arg0, %c8_i32 : i32
    %c0_8 = arith.constant 0 : index
    %c0_9 = arith.constant 0 : index
    %c0_10 = arith.constant 0 : index
    %8 = vector.load %arg1[%c0_8, %c0_9, %c0_10] : memref<8x8x512xbf16, #tpu.memory_space<vmem>>, vector<1x8x512xbf16>
    %9 = vector.shape_cast %8 : vector<1x8x512xbf16> to vector<8x512xbf16>
    %10 = arith.extf %9 : vector<8x512xbf16> to vector<8x512xf32>
    %11 = arith.truncf %3 : vector<8x128xf32> to vector<8x128xbf16>
    %cst = arith.constant dense<0.000000e+00> : vector<8x512xf32>
    %12 = tpu.matmul %11, %5, %cst {dimension_numbers = #tpu.dot_dimension_numbers<[1], [0], [0], [1], [0, 0, 1, 1], [], []>} : vector<8x128xbf16>, vector<128x512xbf16>, vector<8x512xf32> -> vector<8x512xf32>
    %13 = arith.addf %10, %12 : vector<8x512xf32>
    %14 = vector.extract_strided_slice %13 {offsets = [0, 0], sizes = [8, 384], strides = [1, 1]} : vector<8x512xf32> to vector<8x384xf32>
    %15 = arith.negf %14 : vector<8x384xf32>
    %16 = math.exp %15 : vector<8x384xf32>
    %cst_11 = arith.constant 1.000000e+00 : f32
    %17 = vector.broadcast %cst_11 : f32 to vector<8x384xf32>
    %18 = arith.addf %17, %16 : vector<8x384xf32>
    %19 = arith.divf %17, %18 : vector<8x384xf32>
    %20 = vector.extract_strided_slice %19 {offsets = [0, 0], sizes = [8, 128], strides = [1, 1]} : vector<8x384xf32> to vector<8x128xf32>
    %21 = vector.extract_strided_slice %19 {offsets = [0, 128], sizes = [8, 128], strides = [1, 1]} : vector<8x384xf32> to vector<8x128xf32>
    %22 = vector.extract_strided_slice %19 {offsets = [0, 256], sizes = [8, 128], strides = [1, 1]} : vector<8x384xf32> to vector<8x128xf32>
    %23 = vector.extract_strided_slice %13 {offsets = [0, 384], sizes = [8, 128], strides = [1, 1]} : vector<8x512xf32> to vector<8x128xf32>
    %24 = math.tanh %23 : vector<8x128xf32>
    %25 = arith.mulf %21, %4 : vector<8x128xf32>
    %26 = arith.mulf %20, %24 : vector<8x128xf32>
    %27 = arith.addf %25, %26 : vector<8x128xf32>
    %28 = math.tanh %27 : vector<8x128xf32>
    %29 = arith.mulf %22, %28 : vector<8x128xf32>
    %c0_i32_12 = arith.constant 0 : i32
    %30 = arith.addi %7, %c0_i32_12 : i32
    %31 = vector.broadcast %30 : i32 to vector<8x1xi32>
    %32 = arith.cmpi slt, %31, %6 : vector<8x1xi32>
    %cst_13 = arith.constant 0.000000e+00 : f32
    %33 = vector.shape_cast %32 : vector<8x1xi1> to vector<8x1xi1>
    %34 = vector.broadcast %33 : vector<8x1xi1> to vector<8x128xi1>
    %35 = vector.broadcast %cst_13 : f32 to vector<8x128xf32>
    %36 = arith.select %34, %29, %35 : vector<8x128xi1>, vector<8x128xf32>
    %37 = arith.truncf %36 : vector<8x128xf32> to vector<8x128xbf16>
    %c0_14 = arith.constant 0 : index
    %c0_15 = arith.constant 0 : index
    %c0_16 = arith.constant 0 : index
    %38 = vector.load %arg4[%c0_14, %c0_15, %c0_16] : memref<8x8x128xbf16, #tpu.memory_space<vmem>>, vector<1x8x128xbf16>
    %39 = vector.shape_cast %38 : vector<1x8x128xbf16> to vector<8x128xbf16>
    %40 = vector.shape_cast %37 : vector<8x128xbf16> to vector<1x8x128xbf16>
    tpu.vector_store %arg4[%c0_14, %c0_15, %c0_16], %40 {strides = array<i32>} : memref<8x8x128xbf16, #tpu.memory_space<vmem>>, vector<1x8x128xbf16>,
    %41 = vector.shape_cast %32 : vector<8x1xi1> to vector<8x1xi1>
    %42 = vector.broadcast %41 : vector<8x1xi1> to vector<8x128xi1>
    %43 = arith.select %42, %29, %3 : vector<8x128xi1>, vector<8x128xf32>
    %44 = vector.shape_cast %32 : vector<8x1xi1> to vector<8x1xi1>
    %45 = vector.broadcast %44 : vector<8x1xi1> to vector<8x128xi1>
    %46 = arith.select %45, %27, %4 : vector<8x128xi1>, vector<8x128xf32>
    %c1 = arith.constant 1 : index
    %c0_17 = arith.constant 0 : index
    %c0_18 = arith.constant 0 : index
    %47 = vector.load %arg1[%c1, %c0_17, %c0_18] : memref<8x8x512xbf16, #tpu.memory_space<vmem>>, vector<1x8x512xbf16>
    %48 = vector.shape_cast %47 : vector<1x8x512xbf16> to vector<8x512xbf16>
    %49 = arith.extf %48 : vector<8x512xbf16> to vector<8x512xf32>
    %50 = arith.truncf %43 : vector<8x128xf32> to vector<8x128xbf16>
    %cst_19 = arith.constant dense<0.000000e+00> : vector<8x512xf32>
    %51 = tpu.matmul %50, %5, %cst_19 {dimension_numbers = #tpu.dot_dimension_numbers<[1], [0], [0], [1], [0, 0, 1, 1], [], []>} : vector<8x128xbf16>, vector<128x512xbf16>, vector<8x512xf32> -> vector<8x512xf32>
    %52 = arith.addf %49, %51 : vector<8x512xf32>
    %53 = vector.extract_strided_slice %52 {offsets = [0, 0], sizes = [8, 384], strides = [1, 1]} : vector<8x512xf32> to vector<8x384xf32>
    %54 = arith.negf %53 : vector<8x384xf32>
    %55 = math.exp %54 : vector<8x384xf32>
    %cst_20 = arith.constant 1.000000e+00 : f32
    %56 = vector.broadcast %cst_20 : f32 to vector<8x384xf32>
    %57 = arith.addf %56, %55 : vector<8x384xf32>
    %58 = arith.divf %56, %57 : vector<8x384xf32>
    %59 = vector.extract_strided_slice %58 {offsets = [0, 0], sizes = [8, 128], strides = [1, 1]} : vector<8x384xf32> to vector<8x128xf32>
    %60 = vector.extract_strided_slice %58 {offsets = [0, 128], sizes = [8, 128], strides = [1, 1]} : vector<8x384xf32> to vector<8x128xf32>
    %61 = vector.extract_strided_slice %58 {offsets = [0, 256], sizes = [8, 128], strides = [1, 1]} : vector<8x384xf32> to vector<8x128xf32>
    %62 = vector.extract_strided_slice %52 {offsets = [0, 384], sizes = [8, 128], strides = [1, 1]} : vector<8x512xf32> to vector<8x128xf32>
    %63 = math.tanh %62 : vector<8x128xf32>
    %64 = arith.mulf %60, %46 : vector<8x128xf32>
    %65 = arith.mulf %59, %63 : vector<8x128xf32>
    %66 = arith.addf %64, %65 : vector<8x128xf32>
    %67 = math.tanh %66 : vector<8x128xf32>
    %68 = arith.mulf %61, %67 : vector<8x128xf32>
    %c1_i32 = arith.constant 1 : i32
    %69 = arith.addi %7, %c1_i32 : i32
    %70 = vector.broadcast %69 : i32 to vector<8x1xi32>
    %71 = arith.cmpi slt, %70, %6 : vector<8x1xi32>
    %cst_21 = arith.constant 0.000000e+00 : f32
    %72 = vector.shape_cast %71 : vector<8x1xi1> to vector<8x1xi1>
    %73 = vector.broadcast %72 : vector<8x1xi1> to vector<8x128xi1>
    %74 = vector.broadcast %cst_21 : f32 to vector<8x128xf32>
    %75 = arith.select %73, %68, %74 : vector<8x128xi1>, vector<8x128xf32>
    %76 = arith.truncf %75 : vector<8x128xf32> to vector<8x128xbf16>
    %c1_22 = arith.constant 1 : index
    %c0_23 = arith.constant 0 : index
    %c0_24 = arith.constant 0 : index
    %77 = vector.load %arg4[%c1_22, %c0_23, %c0_24] : memref<8x8x128xbf16, #tpu.memory_space<vmem>>, vector<1x8x128xbf16>
    %78 = vector.shape_cast %77 : vector<1x8x128xbf16> to vector<8x128xbf16>
    %79 = vector.shape_cast %76 : vector<8x128xbf16> to vector<1x8x128xbf16>
    tpu.vector_store %arg4[%c1_22, %c0_23, %c0_24], %79 {strides = array<i32>} : memref<8x8x128xbf16, #tpu.memory_space<vmem>>, vector<1x8x128xbf16>,
    %80 = vector.shape_cast %71 : vector<8x1xi1> to vector<8x1xi1>
    %81 = vector.broadcast %80 : vector<8x1xi1> to vector<8x128xi1>
    %82 = arith.select %81, %68, %43 : vector<8x128xi1>, vector<8x128xf32>
    %83 = vector.shape_cast %71 : vector<8x1xi1> to vector<8x1xi1>
    %84 = vector.broadcast %83 : vector<8x1xi1> to vector<8x128xi1>
    %85 = arith.select %84, %66, %46 : vector<8x128xi1>, vector<8x128xf32>
    %c2 = arith.constant 2 : index
    %c0_25 = arith.constant 0 : index
    %c0_26 = arith.constant 0 : index
    %86 = vector.load %arg1[%c2, %c0_25, %c0_26] : memref<8x8x512xbf16, #tpu.memory_space<vmem>>, vector<1x8x512xbf16>
    %87 = vector.shape_cast %86 : vector<1x8x512xbf16> to vector<8x512xbf16>
    %88 = arith.extf %87 : vector<8x512xbf16> to vector<8x512xf32>
    %89 = arith.truncf %82 : vector<8x128xf32> to vector<8x128xbf16>
    %cst_27 = arith.constant dense<0.000000e+00> : vector<8x512xf32>
    %90 = tpu.matmul %89, %5, %cst_27 {dimension_numbers = #tpu.dot_dimension_numbers<[1], [0], [0], [1], [0, 0, 1, 1], [], []>} : vector<8x128xbf16>, vector<128x512xbf16>, vector<8x512xf32> -> vector<8x512xf32>
    %91 = arith.addf %88, %90 : vector<8x512xf32>
    %92 = vector.extract_strided_slice %91 {offsets = [0, 0], sizes = [8, 384], strides = [1, 1]} : vector<8x512xf32> to vector<8x384xf32>
    %93 = arith.negf %92 : vector<8x384xf32>
    %94 = math.exp %93 : vector<8x384xf32>
    %cst_28 = arith.constant 1.000000e+00 : f32
    %95 = vector.broadcast %cst_28 : f32 to vector<8x384xf32>
    %96 = arith.addf %95, %94 : vector<8x384xf32>
    %97 = arith.divf %95, %96 : vector<8x384xf32>
    %98 = vector.extract_strided_slice %97 {offsets = [0, 0], sizes = [8, 128], strides = [1, 1]} : vector<8x384xf32> to vector<8x128xf32>
    %99 = vector.extract_strided_slice %97 {offsets = [0, 128], sizes = [8, 128], strides = [1, 1]} : vector<8x384xf32> to vector<8x128xf32>
    %100 = vector.extract_strided_slice %97 {offsets = [0, 256], sizes = [8, 128], strides = [1, 1]} : vector<8x384xf32> to vector<8x128xf32>
    %101 = vector.extract_strided_slice %91 {offsets = [0, 384], sizes = [8, 128], strides = [1, 1]} : vector<8x512xf32> to vector<8x128xf32>
    %102 = math.tanh %101 : vector<8x128xf32>
    %103 = arith.mulf %99, %85 : vector<8x128xf32>
    %104 = arith.mulf %98, %102 : vector<8x128xf32>
    %105 = arith.addf %103, %104 : vector<8x128xf32>
    %106 = math.tanh %105 : vector<8x128xf32>
    %107 = arith.mulf %100, %106 : vector<8x128xf32>
    %c2_i32 = arith.constant 2 : i32
    %108 = arith.addi %7, %c2_i32 : i32
    %109 = vector.broadcast %108 : i32 to vector<8x1xi32>
    %110 = arith.cmpi slt, %109, %6 : vector<8x1xi32>
    %cst_29 = arith.constant 0.000000e+00 : f32
    %111 = vector.shape_cast %110 : vector<8x1xi1> to vector<8x1xi1>
    %112 = vector.broadcast %111 : vector<8x1xi1> to vector<8x128xi1>
    %113 = vector.broadcast %cst_29 : f32 to vector<8x128xf32>
    %114 = arith.select %112, %107, %113 : vector<8x128xi1>, vector<8x128xf32>
    %115 = arith.truncf %114 : vector<8x128xf32> to vector<8x128xbf16>
    %c2_30 = arith.constant 2 : index
    %c0_31 = arith.constant 0 : index
    %c0_32 = arith.constant 0 : index
    %116 = vector.load %arg4[%c2_30, %c0_31, %c0_32] : memref<8x8x128xbf16, #tpu.memory_space<vmem>>, vector<1x8x128xbf16>
    %117 = vector.shape_cast %116 : vector<1x8x128xbf16> to vector<8x128xbf16>
    %118 = vector.shape_cast %115 : vector<8x128xbf16> to vector<1x8x128xbf16>
    tpu.vector_store %arg4[%c2_30, %c0_31, %c0_32], %118 {strides = array<i32>} : memref<8x8x128xbf16, #tpu.memory_space<vmem>>, vector<1x8x128xbf16>,
    %119 = vector.shape_cast %110 : vector<8x1xi1> to vector<8x1xi1>
    %120 = vector.broadcast %119 : vector<8x1xi1> to vector<8x128xi1>
    %121 = arith.select %120, %107, %82 : vector<8x128xi1>, vector<8x128xf32>
    %122 = vector.shape_cast %110 : vector<8x1xi1> to vector<8x1xi1>
    %123 = vector.broadcast %122 : vector<8x1xi1> to vector<8x128xi1>
    %124 = arith.select %123, %105, %85 : vector<8x128xi1>, vector<8x128xf32>
    %c3 = arith.constant 3 : index
    %c0_33 = arith.constant 0 : index
    %c0_34 = arith.constant 0 : index
    %125 = vector.load %arg1[%c3, %c0_33, %c0_34] : memref<8x8x512xbf16, #tpu.memory_space<vmem>>, vector<1x8x512xbf16>
    %126 = vector.shape_cast %125 : vector<1x8x512xbf16> to vector<8x512xbf16>
    %127 = arith.extf %126 : vector<8x512xbf16> to vector<8x512xf32>
    %128 = arith.truncf %121 : vector<8x128xf32> to vector<8x128xbf16>
    %cst_35 = arith.constant dense<0.000000e+00> : vector<8x512xf32>
    %129 = tpu.matmul %128, %5, %cst_35 {dimension_numbers = #tpu.dot_dimension_numbers<[1], [0], [0], [1], [0, 0, 1, 1], [], []>} : vector<8x128xbf16>, vector<128x512xbf16>, vector<8x512xf32> -> vector<8x512xf32>
    %130 = arith.addf %127, %129 : vector<8x512xf32>
    %131 = vector.extract_strided_slice %130 {offsets = [0, 0], sizes = [8, 384], strides = [1, 1]} : vector<8x512xf32> to vector<8x384xf32>
    %132 = arith.negf %131 : vector<8x384xf32>
    %133 = math.exp %132 : vector<8x384xf32>
    %cst_36 = arith.constant 1.000000e+00 : f32
    %134 = vector.broadcast %cst_36 : f32 to vector<8x384xf32>
    %135 = arith.addf %134, %133 : vector<8x384xf32>
    %136 = arith.divf %134, %135 : vector<8x384xf32>
    %137 = vector.extract_strided_slice %136 {offsets = [0, 0], sizes = [8, 128], strides = [1, 1]} : vector<8x384xf32> to vector<8x128xf32>
    %138 = vector.extract_strided_slice %136 {offsets = [0, 128], sizes = [8, 128], strides = [1, 1]} : vector<8x384xf32> to vector<8x128xf32>
    %139 = vector.extract_strided_slice %136 {offsets = [0, 256], sizes = [8, 128], strides = [1, 1]} : vector<8x384xf32> to vector<8x128xf32>
    %140 = vector.extract_strided_slice %130 {offsets = [0, 384], sizes = [8, 128], strides = [1, 1]} : vector<8x512xf32> to vector<8x128xf32>
    %141 = math.tanh %140 : vector<8x128xf32>
    %142 = arith.mulf %138, %124 : vector<8x128xf32>
    %143 = arith.mulf %137, %141 : vector<8x128xf32>
    %144 = arith.addf %142, %143 : vector<8x128xf32>
    %145 = math.tanh %144 : vector<8x128xf32>
    %146 = arith.mulf %139, %145 : vector<8x128xf32>
    %c3_i32 = arith.constant 3 : i32
    %147 = arith.addi %7, %c3_i32 : i32
    %148 = vector.broadcast %147 : i32 to vector<8x1xi32>
    %149 = arith.cmpi slt, %148, %6 : vector<8x1xi32>
    %cst_37 = arith.constant 0.000000e+00 : f32
    %150 = vector.shape_cast %149 : vector<8x1xi1> to vector<8x1xi1>
    %151 = vector.broadcast %150 : vector<8x1xi1> to vector<8x128xi1>
    %152 = vector.broadcast %cst_37 : f32 to vector<8x128xf32>
    %153 = arith.select %151, %146, %152 : vector<8x128xi1>, vector<8x128xf32>
    %154 = arith.truncf %153 : vector<8x128xf32> to vector<8x128xbf16>
    %c3_38 = arith.constant 3 : index
    %c0_39 = arith.constant 0 : index
    %c0_40 = arith.constant 0 : index
    %155 = vector.load %arg4[%c3_38, %c0_39, %c0_40] : memref<8x8x128xbf16, #tpu.memory_space<vmem>>, vector<1x8x128xbf16>
    %156 = vector.shape_cast %155 : vector<1x8x128xbf16> to vector<8x128xbf16>
    %157 = vector.shape_cast %154 : vector<8x128xbf16> to vector<1x8x128xbf16>
    tpu.vector_store %arg4[%c3_38, %c0_39, %c0_40], %157 {strides = array<i32>} : memref<8x8x128xbf16, #tpu.memory_space<vmem>>, vector<1x8x128xbf16>,
    %158 = vector.shape_cast %149 : vector<8x1xi1> to vector<8x1xi1>
    %159 = vector.broadcast %158 : vector<8x1xi1> to vector<8x128xi1>
    %160 = arith.select %159, %146, %121 : vector<8x128xi1>, vector<8x128xf32>
    %161 = vector.shape_cast %149 : vector<8x1xi1> to vector<8x1xi1>
    %162 = vector.broadcast %161 : vector<8x1xi1> to vector<8x128xi1>
    %163 = arith.select %162, %144, %124 : vector<8x128xi1>, vector<8x128xf32>
    %c4 = arith.constant 4 : index
    %c0_41 = arith.constant 0 : index
    %c0_42 = arith.constant 0 : index
    %164 = vector.load %arg1[%c4, %c0_41, %c0_42] : memref<8x8x512xbf16, #tpu.memory_space<vmem>>, vector<1x8x512xbf16>
    %165 = vector.shape_cast %164 : vector<1x8x512xbf16> to vector<8x512xbf16>
    %166 = arith.extf %165 : vector<8x512xbf16> to vector<8x512xf32>
    %167 = arith.truncf %160 : vector<8x128xf32> to vector<8x128xbf16>
    %cst_43 = arith.constant dense<0.000000e+00> : vector<8x512xf32>
    %168 = tpu.matmul %167, %5, %cst_43 {dimension_numbers = #tpu.dot_dimension_numbers<[1], [0], [0], [1], [0, 0, 1, 1], [], []>} : vector<8x128xbf16>, vector<128x512xbf16>, vector<8x512xf32> -> vector<8x512xf32>
    %169 = arith.addf %166, %168 : vector<8x512xf32>
    %170 = vector.extract_strided_slice %169 {offsets = [0, 0], sizes = [8, 384], strides = [1, 1]} : vector<8x512xf32> to vector<8x384xf32>
    %171 = arith.negf %170 : vector<8x384xf32>
    %172 = math.exp %171 : vector<8x384xf32>
    %cst_44 = arith.constant 1.000000e+00 : f32
    %173 = vector.broadcast %cst_44 : f32 to vector<8x384xf32>
    %174 = arith.addf %173, %172 : vector<8x384xf32>
    %175 = arith.divf %173, %174 : vector<8x384xf32>
    %176 = vector.extract_strided_slice %175 {offsets = [0, 0], sizes = [8, 128], strides = [1, 1]} : vector<8x384xf32> to vector<8x128xf32>
    %177 = vector.extract_strided_slice %175 {offsets = [0, 128], sizes = [8, 128], strides = [1, 1]} : vector<8x384xf32> to vector<8x128xf32>
    %178 = vector.extract_strided_slice %175 {offsets = [0, 256], sizes = [8, 128], strides = [1, 1]} : vector<8x384xf32> to vector<8x128xf32>
    %179 = vector.extract_strided_slice %169 {offsets = [0, 384], sizes = [8, 128], strides = [1, 1]} : vector<8x512xf32> to vector<8x128xf32>
    %180 = math.tanh %179 : vector<8x128xf32>
    %181 = arith.mulf %177, %163 : vector<8x128xf32>
    %182 = arith.mulf %176, %180 : vector<8x128xf32>
    %183 = arith.addf %181, %182 : vector<8x128xf32>
    %184 = math.tanh %183 : vector<8x128xf32>
    %185 = arith.mulf %178, %184 : vector<8x128xf32>
    %c4_i32 = arith.constant 4 : i32
    %186 = arith.addi %7, %c4_i32 : i32
    %187 = vector.broadcast %186 : i32 to vector<8x1xi32>
    %188 = arith.cmpi slt, %187, %6 : vector<8x1xi32>
    %cst_45 = arith.constant 0.000000e+00 : f32
    %189 = vector.shape_cast %188 : vector<8x1xi1> to vector<8x1xi1>
    %190 = vector.broadcast %189 : vector<8x1xi1> to vector<8x128xi1>
    %191 = vector.broadcast %cst_45 : f32 to vector<8x128xf32>
    %192 = arith.select %190, %185, %191 : vector<8x128xi1>, vector<8x128xf32>
    %193 = arith.truncf %192 : vector<8x128xf32> to vector<8x128xbf16>
    %c4_46 = arith.constant 4 : index
    %c0_47 = arith.constant 0 : index
    %c0_48 = arith.constant 0 : index
    %194 = vector.load %arg4[%c4_46, %c0_47, %c0_48] : memref<8x8x128xbf16, #tpu.memory_space<vmem>>, vector<1x8x128xbf16>
    %195 = vector.shape_cast %194 : vector<1x8x128xbf16> to vector<8x128xbf16>
    %196 = vector.shape_cast %193 : vector<8x128xbf16> to vector<1x8x128xbf16>
    tpu.vector_store %arg4[%c4_46, %c0_47, %c0_48], %196 {strides = array<i32>} : memref<8x8x128xbf16, #tpu.memory_space<vmem>>, vector<1x8x128xbf16>,
    %197 = vector.shape_cast %188 : vector<8x1xi1> to vector<8x1xi1>
    %198 = vector.broadcast %197 : vector<8x1xi1> to vector<8x128xi1>
    %199 = arith.select %198, %185, %160 : vector<8x128xi1>, vector<8x128xf32>
    %200 = vector.shape_cast %188 : vector<8x1xi1> to vector<8x1xi1>
    %201 = vector.broadcast %200 : vector<8x1xi1> to vector<8x128xi1>
    %202 = arith.select %201, %183, %163 : vector<8x128xi1>, vector<8x128xf32>
    %c5 = arith.constant 5 : index
    %c0_49 = arith.constant 0 : index
    %c0_50 = arith.constant 0 : index
    %203 = vector.load %arg1[%c5, %c0_49, %c0_50] : memref<8x8x512xbf16, #tpu.memory_space<vmem>>, vector<1x8x512xbf16>
    %204 = vector.shape_cast %203 : vector<1x8x512xbf16> to vector<8x512xbf16>
    %205 = arith.extf %204 : vector<8x512xbf16> to vector<8x512xf32>
    %206 = arith.truncf %199 : vector<8x128xf32> to vector<8x128xbf16>
    %cst_51 = arith.constant dense<0.000000e+00> : vector<8x512xf32>
    %207 = tpu.matmul %206, %5, %cst_51 {dimension_numbers = #tpu.dot_dimension_numbers<[1], [0], [0], [1], [0, 0, 1, 1], [], []>} : vector<8x128xbf16>, vector<128x512xbf16>, vector<8x512xf32> -> vector<8x512xf32>
    %208 = arith.addf %205, %207 : vector<8x512xf32>
    %209 = vector.extract_strided_slice %208 {offsets = [0, 0], sizes = [8, 384], strides = [1, 1]} : vector<8x512xf32> to vector<8x384xf32>
    %210 = arith.negf %209 : vector<8x384xf32>
    %211 = math.exp %210 : vector<8x384xf32>
    %cst_52 = arith.constant 1.000000e+00 : f32
    %212 = vector.broadcast %cst_52 : f32 to vector<8x384xf32>
    %213 = arith.addf %212, %211 : vector<8x384xf32>
    %214 = arith.divf %212, %213 : vector<8x384xf32>
    %215 = vector.extract_strided_slice %214 {offsets = [0, 0], sizes = [8, 128], strides = [1, 1]} : vector<8x384xf32> to vector<8x128xf32>
    %216 = vector.extract_strided_slice %214 {offsets = [0, 128], sizes = [8, 128], strides = [1, 1]} : vector<8x384xf32> to vector<8x128xf32>
    %217 = vector.extract_strided_slice %214 {offsets = [0, 256], sizes = [8, 128], strides = [1, 1]} : vector<8x384xf32> to vector<8x128xf32>
    %218 = vector.extract_strided_slice %208 {offsets = [0, 384], sizes = [8, 128], strides = [1, 1]} : vector<8x512xf32> to vector<8x128xf32>
    %219 = math.tanh %218 : vector<8x128xf32>
    %220 = arith.mulf %216, %202 : vector<8x128xf32>
    %221 = arith.mulf %215, %219 : vector<8x128xf32>
    %222 = arith.addf %220, %221 : vector<8x128xf32>
    %223 = math.tanh %222 : vector<8x128xf32>
    %224 = arith.mulf %217, %223 : vector<8x128xf32>
    %c5_i32 = arith.constant 5 : i32
    %225 = arith.addi %7, %c5_i32 : i32
    %226 = vector.broadcast %225 : i32 to vector<8x1xi32>
    %227 = arith.cmpi slt, %226, %6 : vector<8x1xi32>
    %cst_53 = arith.constant 0.000000e+00 : f32
    %228 = vector.shape_cast %227 : vector<8x1xi1> to vector<8x1xi1>
    %229 = vector.broadcast %228 : vector<8x1xi1> to vector<8x128xi1>
    %230 = vector.broadcast %cst_53 : f32 to vector<8x128xf32>
    %231 = arith.select %229, %224, %230 : vector<8x128xi1>, vector<8x128xf32>
    %232 = arith.truncf %231 : vector<8x128xf32> to vector<8x128xbf16>
    %c5_54 = arith.constant 5 : index
    %c0_55 = arith.constant 0 : index
    %c0_56 = arith.constant 0 : index
    %233 = vector.load %arg4[%c5_54, %c0_55, %c0_56] : memref<8x8x128xbf16, #tpu.memory_space<vmem>>, vector<1x8x128xbf16>
    %234 = vector.shape_cast %233 : vector<1x8x128xbf16> to vector<8x128xbf16>
    %235 = vector.shape_cast %232 : vector<8x128xbf16> to vector<1x8x128xbf16>
    tpu.vector_store %arg4[%c5_54, %c0_55, %c0_56], %235 {strides = array<i32>} : memref<8x8x128xbf16, #tpu.memory_space<vmem>>, vector<1x8x128xbf16>,
    %236 = vector.shape_cast %227 : vector<8x1xi1> to vector<8x1xi1>
    %237 = vector.broadcast %236 : vector<8x1xi1> to vector<8x128xi1>
    %238 = arith.select %237, %224, %199 : vector<8x128xi1>, vector<8x128xf32>
    %239 = vector.shape_cast %227 : vector<8x1xi1> to vector<8x1xi1>
    %240 = vector.broadcast %239 : vector<8x1xi1> to vector<8x128xi1>
    %241 = arith.select %240, %222, %202 : vector<8x128xi1>, vector<8x128xf32>
    %c6 = arith.constant 6 : index
    %c0_57 = arith.constant 0 : index
    %c0_58 = arith.constant 0 : index
    %242 = vector.load %arg1[%c6, %c0_57, %c0_58] : memref<8x8x512xbf16, #tpu.memory_space<vmem>>, vector<1x8x512xbf16>
    %243 = vector.shape_cast %242 : vector<1x8x512xbf16> to vector<8x512xbf16>
    %244 = arith.extf %243 : vector<8x512xbf16> to vector<8x512xf32>
    %245 = arith.truncf %238 : vector<8x128xf32> to vector<8x128xbf16>
    %cst_59 = arith.constant dense<0.000000e+00> : vector<8x512xf32>
    %246 = tpu.matmul %245, %5, %cst_59 {dimension_numbers = #tpu.dot_dimension_numbers<[1], [0], [0], [1], [0, 0, 1, 1], [], []>} : vector<8x128xbf16>, vector<128x512xbf16>, vector<8x512xf32> -> vector<8x512xf32>
    %247 = arith.addf %244, %246 : vector<8x512xf32>
    %248 = vector.extract_strided_slice %247 {offsets = [0, 0], sizes = [8, 384], strides = [1, 1]} : vector<8x512xf32> to vector<8x384xf32>
    %249 = arith.negf %248 : vector<8x384xf32>
    %250 = math.exp %249 : vector<8x384xf32>
    %cst_60 = arith.constant 1.000000e+00 : f32
    %251 = vector.broadcast %cst_60 : f32 to vector<8x384xf32>
    %252 = arith.addf %251, %250 : vector<8x384xf32>
    %253 = arith.divf %251, %252 : vector<8x384xf32>
    %254 = vector.extract_strided_slice %253 {offsets = [0, 0], sizes = [8, 128], strides = [1, 1]} : vector<8x384xf32> to vector<8x128xf32>
    %255 = vector.extract_strided_slice %253 {offsets = [0, 128], sizes = [8, 128], strides = [1, 1]} : vector<8x384xf32> to vector<8x128xf32>
    %256 = vector.extract_strided_slice %253 {offsets = [0, 256], sizes = [8, 128], strides = [1, 1]} : vector<8x384xf32> to vector<8x128xf32>
    %257 = vector.extract_strided_slice %247 {offsets = [0, 384], sizes = [8, 128], strides = [1, 1]} : vector<8x512xf32> to vector<8x128xf32>
    %258 = math.tanh %257 : vector<8x128xf32>
    %259 = arith.mulf %255, %241 : vector<8x128xf32>
    %260 = arith.mulf %254, %258 : vector<8x128xf32>
    %261 = arith.addf %259, %260 : vector<8x128xf32>
    %262 = math.tanh %261 : vector<8x128xf32>
    %263 = arith.mulf %256, %262 : vector<8x128xf32>
    %c6_i32 = arith.constant 6 : i32
    %264 = arith.addi %7, %c6_i32 : i32
    %265 = vector.broadcast %264 : i32 to vector<8x1xi32>
    %266 = arith.cmpi slt, %265, %6 : vector<8x1xi32>
    %cst_61 = arith.constant 0.000000e+00 : f32
    %267 = vector.shape_cast %266 : vector<8x1xi1> to vector<8x1xi1>
    %268 = vector.broadcast %267 : vector<8x1xi1> to vector<8x128xi1>
    %269 = vector.broadcast %cst_61 : f32 to vector<8x128xf32>
    %270 = arith.select %268, %263, %269 : vector<8x128xi1>, vector<8x128xf32>
    %271 = arith.truncf %270 : vector<8x128xf32> to vector<8x128xbf16>
    %c6_62 = arith.constant 6 : index
    %c0_63 = arith.constant 0 : index
    %c0_64 = arith.constant 0 : index
    %272 = vector.load %arg4[%c6_62, %c0_63, %c0_64] : memref<8x8x128xbf16, #tpu.memory_space<vmem>>, vector<1x8x128xbf16>
    %273 = vector.shape_cast %272 : vector<1x8x128xbf16> to vector<8x128xbf16>
    %274 = vector.shape_cast %271 : vector<8x128xbf16> to vector<1x8x128xbf16>
    tpu.vector_store %arg4[%c6_62, %c0_63, %c0_64], %274 {strides = array<i32>} : memref<8x8x128xbf16, #tpu.memory_space<vmem>>, vector<1x8x128xbf16>,
    %275 = vector.shape_cast %266 : vector<8x1xi1> to vector<8x1xi1>
    %276 = vector.broadcast %275 : vector<8x1xi1> to vector<8x128xi1>
    %277 = arith.select %276, %263, %238 : vector<8x128xi1>, vector<8x128xf32>
    %278 = vector.shape_cast %266 : vector<8x1xi1> to vector<8x1xi1>
    %279 = vector.broadcast %278 : vector<8x1xi1> to vector<8x128xi1>
    %280 = arith.select %279, %261, %241 : vector<8x128xi1>, vector<8x128xf32>
    %c7 = arith.constant 7 : index
    %c0_65 = arith.constant 0 : index
    %c0_66 = arith.constant 0 : index
    %281 = vector.load %arg1[%c7, %c0_65, %c0_66] : memref<8x8x512xbf16, #tpu.memory_space<vmem>>, vector<1x8x512xbf16>
    %282 = vector.shape_cast %281 : vector<1x8x512xbf16> to vector<8x512xbf16>
    %283 = arith.extf %282 : vector<8x512xbf16> to vector<8x512xf32>
    %284 = arith.truncf %277 : vector<8x128xf32> to vector<8x128xbf16>
    %cst_67 = arith.constant dense<0.000000e+00> : vector<8x512xf32>
    %285 = tpu.matmul %284, %5, %cst_67 {dimension_numbers = #tpu.dot_dimension_numbers<[1], [0], [0], [1], [0, 0, 1, 1], [], []>} : vector<8x128xbf16>, vector<128x512xbf16>, vector<8x512xf32> -> vector<8x512xf32>
    %286 = arith.addf %283, %285 : vector<8x512xf32>
    %287 = vector.extract_strided_slice %286 {offsets = [0, 0], sizes = [8, 384], strides = [1, 1]} : vector<8x512xf32> to vector<8x384xf32>
    %288 = arith.negf %287 : vector<8x384xf32>
    %289 = math.exp %288 : vector<8x384xf32>
    %cst_68 = arith.constant 1.000000e+00 : f32
    %290 = vector.broadcast %cst_68 : f32 to vector<8x384xf32>
    %291 = arith.addf %290, %289 : vector<8x384xf32>
    %292 = arith.divf %290, %291 : vector<8x384xf32>
    %293 = vector.extract_strided_slice %292 {offsets = [0, 0], sizes = [8, 128], strides = [1, 1]} : vector<8x384xf32> to vector<8x128xf32>
    %294 = vector.extract_strided_slice %292 {offsets = [0, 128], sizes = [8, 128], strides = [1, 1]} : vector<8x384xf32> to vector<8x128xf32>
    %295 = vector.extract_strided_slice %292 {offsets = [0, 256], sizes = [8, 128], strides = [1, 1]} : vector<8x384xf32> to vector<8x128xf32>
    %296 = vector.extract_strided_slice %286 {offsets = [0, 384], sizes = [8, 128], strides = [1, 1]} : vector<8x512xf32> to vector<8x128xf32>
    %297 = math.tanh %296 : vector<8x128xf32>
    %298 = arith.mulf %294, %280 : vector<8x128xf32>
    %299 = arith.mulf %293, %297 : vector<8x128xf32>
    %300 = arith.addf %298, %299 : vector<8x128xf32>
    %301 = math.tanh %300 : vector<8x128xf32>
    %302 = arith.mulf %295, %301 : vector<8x128xf32>
    %c7_i32 = arith.constant 7 : i32
    %303 = arith.addi %7, %c7_i32 : i32
    %304 = vector.broadcast %303 : i32 to vector<8x1xi32>
    %305 = arith.cmpi slt, %304, %6 : vector<8x1xi32>
    %cst_69 = arith.constant 0.000000e+00 : f32
    %306 = vector.shape_cast %305 : vector<8x1xi1> to vector<8x1xi1>
    %307 = vector.broadcast %306 : vector<8x1xi1> to vector<8x128xi1>
    %308 = vector.broadcast %cst_69 : f32 to vector<8x128xf32>
    %309 = arith.select %307, %302, %308 : vector<8x128xi1>, vector<8x128xf32>
    %310 = arith.truncf %309 : vector<8x128xf32> to vector<8x128xbf16>
    %c7_70 = arith.constant 7 : index
    %c0_71 = arith.constant 0 : index
    %c0_72 = arith.constant 0 : index
    %311 = vector.load %arg4[%c7_70, %c0_71, %c0_72] : memref<8x8x128xbf16, #tpu.memory_space<vmem>>, vector<1x8x128xbf16>
    %312 = vector.shape_cast %311 : vector<1x8x128xbf16> to vector<8x128xbf16>
    %313 = vector.shape_cast %310 : vector<8x128xbf16> to vector<1x8x128xbf16>
    tpu.vector_store %arg4[%c7_70, %c0_71, %c0_72], %313 {strides = array<i32>} : memref<8x8x128xbf16, #tpu.memory_space<vmem>>, vector<1x8x128xbf16>,
    %314 = vector.shape_cast %305 : vector<8x1xi1> to vector<8x1xi1>
    %315 = vector.broadcast %314 : vector<8x1xi1> to vector<8x128xi1>
    %316 = arith.select %315, %302, %277 : vector<8x128xi1>, vector<8x128xf32>
    %317 = vector.shape_cast %305 : vector<8x1xi1> to vector<8x1xi1>
    %318 = vector.broadcast %317 : vector<8x1xi1> to vector<8x128xi1>
    %319 = arith.select %318, %300, %280 : vector<8x128xi1>, vector<8x128xf32>
    %c0_73 = arith.constant 0 : index
    %c0_74 = arith.constant 0 : index
    %320 = vector.load %arg7[%c0_73, %c0_74] : memref<8x128xf32, #tpu.memory_space<vmem>>, vector<8x128xf32>
    tpu.vector_store %arg7[%c0_73, %c0_74], %316 {strides = array<i32>} : memref<8x128xf32, #tpu.memory_space<vmem>>, vector<8x128xf32>,
    %c0_75 = arith.constant 0 : index
    %c0_76 = arith.constant 0 : index
    %321 = vector.load %arg8[%c0_75, %c0_76] : memref<8x128xf32, #tpu.memory_space<vmem>>, vector<8x128xf32>
    tpu.vector_store %arg8[%c0_75, %c0_76], %319 {strides = array<i32>} : memref<8x128xf32, #tpu.memory_space<vmem>>, vector<8x128xf32>,
    %c0_i32_77 = arith.constant 0 : i32
    %322 = arith.cmpi eq, %arg0, %c0_i32_77 : i32
    %323 = arith.extui %322 : i1 to i32
    %c0_i32_78 = arith.constant 0 : i32
    %324 = arith.cmpi ne, %323, %c0_i32_78 : i32
    scf.if %324 {
      %c0_79 = arith.constant 0 : index
      %c0_80 = arith.constant 0 : index
      %325 = vector.load %arg5[%c0_79, %c0_80] : memref<8x128xf32, #tpu.memory_space<vmem>>, vector<8x128xf32>
      tpu.vector_store %arg5[%c0_79, %c0_80], %316 {strides = array<i32>} : memref<8x128xf32, #tpu.memory_space<vmem>>, vector<8x128xf32>,
      %c0_81 = arith.constant 0 : index
      %c0_82 = arith.constant 0 : index
      %326 = vector.load %arg6[%c0_81, %c0_82] : memref<8x128xf32, #tpu.memory_space<vmem>>, vector<8x128xf32>
      tpu.vector_store %arg6[%c0_81, %c0_82], %319 {strides = array<i32>} : memref<8x128xf32, #tpu.memory_space<vmem>>, vector<8x128xf32>,
    } else {
    }
    return
  }
  func.func @transform_0(%arg0: i32) -> (i32, i32, i32) {
    %c0_i32 = arith.constant 0 : i32
    %c0_i32_0 = arith.constant 0 : i32
    %c0_i32_1 = arith.constant 0 : i32
    return %arg0, %c0_i32, %c0_i32_0 : i32, i32, i32
  }
  func.func @transform_1(%arg0: i32) -> (i32, i32) {
    %c0_i32 = arith.constant 0 : i32
    %c0_i32_0 = arith.constant 0 : i32
    %c0_i32_1 = arith.constant 0 : i32
    return %c0_i32, %c0_i32_0 : i32, i32
  }
  func.func @transform_2(%arg0: i32) -> (i32, i32) {
    %c0_i32 = arith.constant 0 : i32
    %c0_i32_0 = arith.constant 0 : i32
    %c0_i32_1 = arith.constant 0 : i32
    return %c0_i32, %c0_i32_0 : i32, i32
  }
  func.func @transform_3(%arg0: i32) -> (i32, i32, i32) {
    %c0_i32 = arith.constant 0 : i32
    %c0_i32_0 = arith.constant 0 : i32
    %c0_i32_1 = arith.constant 0 : i32
    return %arg0, %c0_i32, %c0_i32_0 : i32, i32, i32
  }
  func.func @transform_4(%arg0: i32) -> (i32, i32) {
    %c0_i32 = arith.constant 0 : i32
    %c0_i32_0 = arith.constant 0 : i32
    %c0_i32_1 = arith.constant 0 : i32
    return %c0_i32, %c0_i32_0 : i32, i32
  }
  func.func @transform_5(%arg0: i32) -> (i32, i32) {
    %c0_i32 = arith.constant 0 : i32
    %c0_i32_0 = arith.constant 0 : i32
    %c0_i32_1 = arith.constant 0 : i32
    return %c0_i32, %c0_i32_0 : i32, i32
  }
}

</mosaic_0001>

<bundles_post_ra>
// kernel: tpu_custom_call.1
= control target key start
LH: loop header
LB: loop body
LE: loop exit
PB: predicated region body
PF: predicated region fallthrough
CT: control target
= control target key end

     0   :  { %11 = vsyncpa [#allocation5], 0  ;;  %s2347_s0 = inlined_call_operand.hbm [shape: bf16[8,8,512], index: 0, kind: input, shape index: {}]   ;;  %s2348_s1 = inlined_call_operand.vmem [shape: s32[8,1], index: 1, kind: input, shape index: {}]   ;;  %s2349_s2 = inlined_call_operand.hbm [shape: bf16[128,512], index: 2, kind: input, shape index: {}]   ;;  %s2350_s3 = inlined_call_operand.hbm [shape: bf16[8,8,128], index: 3, kind: output, shape index: {0}]   ;;  %s2351_s4 = inlined_call_operand.hbm [shape: f32[8,128], index: 4, kind: output, shape index: {1}]   ;;  %s2352_s5 = inlined_call_operand.hbm [shape: f32[8,128], index: 5, kind: output, shape index: {2}]  }
   0x1   :  { %12 = vsyncpa [#allocation8], 0 }
   0x2   :  { %13 = vsyncpa [#allocation6], 0 }
   0x3   :  { %14 = vsyncpa [#allocation11], 0  ;;  %s1764_s18 = smov [#allocation4]   ;;  %s1646_s22 = scalar_lea.hbm %s2347_s0, 2048 }
   0x4   :  { %s20_s19 = sshll.u32 %s1764_s18, 4  ;;  %p1647_p0 = scmp.ne.s32.totalorder %s2347_s0, %s1646_s22  ;;  %s21_s19 = int_to_ptr.vmem [resolvable:$true] %s20_s19 }
   0x5   :  { %p1650_p1 = scmp.lt.u32.totalorder %s1646_s22, %s2347_s0 }
   0x7   :  { %p1652_p2 = pnand %p1650_p1, %p1647_p0 }
   0x9   :  { %1655 = shalt.err (!%p1652_p2)
}
   0xa   :  { %s1656_s27 = scalar_lea.vmem %s21_s19, 2048  ;;  %p1661_p4 = scmp.lt.s32.totalorder %s21_s19, %s21_s19 }
   0xb   :  { %p1657_p3 = scmp.ne.s32.totalorder %s21_s19, %s1656_s27  ;;  %p1662_p5 = scmp.lt.s32.totalorder %s1656_s27, %s1656_s27 }
   0xd   :  { %p1663_p6 = por %p1662_p5, %p1661_p4 }
   0xf   :  { %p1664_p7 = pnand %p1663_p6, %p1657_p3 }
  0x11   :  { %1667 = shalt.err (!%p1664_p7)
}
  0x12   :  { %s1765_s28 = smov 256   ;;  %s1766_s29 = smov 16  }
  0x13   :  { %26 = dma.hbm_to_vmem [thread:$0]  %s2347_s0, 2048, %s21_s19, [#allocation5], %s1765_s28, %s1765_s28, %s1766_s29  }
  0x14   :  { %s1767_s7 = smov [#allocation7]   ;;  %s1668_s11 = scalar_lea.hbm %s2349_s2, 4096 }
  0x15   :  { %s34_s8 = sshll.u32 %s1767_s7, 4  ;;  %p1669_p8 = scmp.ne.s32.totalorder %s2349_s2, %s1668_s11  ;;  %s35_s8 = int_to_ptr.vmem [resolvable:$true] %s34_s8 }
  0x16   :  { %p1672_p9 = scmp.lt.u32.totalorder %s1668_s11, %s2349_s2 }
  0x18   :  { %p1674_p10 = pnand %p1672_p9, %p1669_p8 }
  0x1a   :  { %1677 = shalt.err (!%p1674_p10)
}
  0x1b   :  { %s1678_s16 = scalar_lea.vmem %s35_s8, 4096  ;;  %p1683_p12 = scmp.lt.s32.totalorder %s35_s8, %s35_s8 }
  0x1c   :  { %p1679_p11 = scmp.ne.s32.totalorder %s35_s8, %s1678_s16  ;;  %p1684_p13 = scmp.lt.s32.totalorder %s1678_s16, %s1678_s16 }
  0x1e   :  { %p1685_p0 = por %p1684_p13, %p1683_p12 }
  0x20   :  { %p1686_p1 = pnand %p1685_p0, %p1679_p11 }
  0x22   :  { %1689 = shalt.err (!%p1686_p1)
}
  0x23   :  { %40 = dma.hbm_to_vmem [thread:$0]  %s2349_s2, 4096, %s35_s8, [#allocation8], %s1765_s28, %s1765_s28, %s1766_s29  }
  0x24   :  { %1756 = dma.done.wait [#allocation5], 2048  }
  0x25   :  { %1757 = vsyncadd [#allocation5], 4294965248 }
  0x26   :  { %1758 = dma.done.wait [#allocation8], 4096  }
  0x27   :  { %1759 = vsyncadd [#allocation8], 4294963200  ;;  %v1768_v0 = vmov 0   ;;  %v1833_v1 = vld [vmem:[#allocation7 + $0x4] ss:$16 sps:$4 sm:$0xff]   ;;  %v1769_v37 = vmov 0.0|0.0  }
  0x28   :  { %289 = vmatprep.mubr.bf16.mxu0 %v1768_v0  ;;  %330 = vmatprep.mubr.bf16.mxu1 %v1768_v0  ;;  %v1835_v2 = vld [vmem:[#allocation7] ss:$16 sps:$4 sm:$0xff]   ;;  %v1838_v3 = vld [vmem:[#allocation7 + $0x24] ss:$16 sps:$4 sm:$0xff]   ;;  %v1846_v6 = vld [vmem:[#allocation7 + $0xc] ss:$16 sps:$4 sm:$0xff]  }
  0x29   :  { %1436 = vset.pattern.permute.xlu0 %v1768_v0  ;;  %1437 = vset.pattern.permute.xlu1 %v1768_v0  ;;  %v1841_v4 = vld [vmem:[#allocation7 + $0x20] ss:$16 sps:$4 sm:$0xff]   ;;  %v1844_v5 = vld [vmem:[#allocation7 + $0x44] ss:$16 sps:$4 sm:$0xff]   ;;  %v1848_v7 = vld [vmem:[#allocation7 + $0x8] ss:$16 sps:$4 sm:$0xff]  }
  0x2a   :  { %257 = vmatprep.subr.bf16.mxu0 %v1833_v1  ;;  %v1851_v8 = vld [vmem:[#allocation7 + $0x40] ss:$16 sps:$4 sm:$0xff]   ;;  %298 = vmatprep.subr.bf16.mxu1 %v1846_v6  ;;  %v1855_v9 = vld [vmem:[#allocation7 + $0x64] ss:$16 sps:$4 sm:$0xff]   ;;  %v1858_v10 = vld [vmem:[#allocation7 + $0x2c] ss:$16 sps:$4 sm:$0xff]  }
  0x2b   :  { %258 = vmatpush1.bf16.msra.mxu0 %v1835_v2  ;;  %299 = vmatpush1.bf16.msra.mxu1 %v1848_v7  ;;  %v1860_v11 = vld [vmem:[#allocation7 + $0x28] ss:$16 sps:$4 sm:$0xff]   ;;  %v1864_v12 = vld [vmem:[#allocation7 + $0x60] ss:$16 sps:$4 sm:$0xff]   ;;  %v1866_v13 = vld [vmem:[#allocation7 + $0x84] ss:$16 sps:$4 sm:$0xff]  }
  0x2c   :  { %259 = vmatprep.subr.bf16.mxu0 %v1838_v3  ;;  %300 = vmatprep.subr.bf16.mxu1 %v1858_v10  ;;  %v1868_v14 = vld [vmem:[#allocation7 + $0x4c] ss:$16 sps:$4 sm:$0xff]   ;;  %v1872_v15 = vld [vmem:[#allocation7 + $0x48] ss:$16 sps:$4 sm:$0xff]   ;;  %v1878_v17 = vld [vmem:[#allocation7 + $0x80] ss:$16 sps:$4 sm:$0xff]  }
  0x2d   :  { %v1875_v16 = vld [vmem:[#allocation7 + $0x6c] ss:$16 sps:$4 sm:$0xff]   ;;  %v1881_v18 = vld [vmem:[#allocation7 + $0xa4] ss:$16 sps:$4 sm:$0xff]   ;;  %v1884_v19 = vld [vmem:[#allocation7 + $0x68] ss:$16 sps:$4 sm:$0xff]  }
  0x2e   :  { %v1887_v20 = vld [vmem:[#allocation7 + $0x8c] ss:$16 sps:$4 sm:$0xff]   ;;  %v1890_v21 = vld [vmem:[#allocation7 + $0xa0] ss:$16 sps:$4 sm:$0xff]   ;;  %v1892_v22 = vld [vmem:[#allocation7 + $0xc4] ss:$16 sps:$4 sm:$0xff]  }
  0x2f   :  { %260 = vmatpush1.bf16.msra.mxu0 %v1841_v4  ;;  %301 = vmatpush1.bf16.msra.mxu1 %v1860_v11  ;;  %v1896_v23 = vld [vmem:[#allocation7 + $0x88] ss:$16 sps:$4 sm:$0xff]   ;;  %v1899_v24 = vld [vmem:[#allocation7 + $0xac] ss:$16 sps:$4 sm:$0xff]   ;;  %v1904_v25 = vld [vmem:[%s2348_s1] sm:$0xff]  ;;  %s1770_s1 = smov [#allocation10]  }
  0x30   :  { %261 = vmatprep.subr.bf16.mxu0 %v1844_v5  ;;  %302 = vmatprep.subr.bf16.mxu1 %v1868_v14  ;;  %vm1390_vm0 = vcmp.gt.s32.totalorder %v1904_v25, 0  ;;  %v1908_v26 = vld [vmem:[#allocation7 + $0xc0] ss:$16 sps:$4 sm:$0xff]   ;;  %vm1394_vm1 = vcmp.gt.s32.totalorder %v1904_v25, 1  ;;  %v1913_v28 = vld [vmem:[#allocation7 + $0xe4] ss:$16 sps:$4 sm:$0xff]  }
  0x31   :  { %v369_v27 = vsel %vm1390_vm0, 1, %v1768_v0  ;;  %v1916_v29 = vld [vmem:[#allocation7 + $0xa8] ss:$16 sps:$4 sm:$0xff]   ;;  %v1919_v30 = vld [vmem:[#allocation7 + $0xcc] ss:$16 sps:$4 sm:$0xff]   ;;  %v500_v31 = vsel %vm1394_vm1, 1, %v1768_v0 }
  0x32   :  { %371 = vperm.xlu0 %1436, %v369_v27   ;;  %v1923_v32 = vld [vmem:[#allocation7 + $0xe0] ss:$16 sps:$4 sm:$0xff]   ;;  %vm1406_vm2 = vcmp.gt.s32.totalorder %v1904_v25, 4  ;;  %v1928_v33 = vld [vmem:[#allocation7 + $0xc8] ss:$16 sps:$4 sm:$0xff]   ;;  %vm1414_vm3 = vcmp.gt.s32.totalorder %v1904_v25, 6 }
  0x33   :  { %262 = vmatpush1.bf16.msra.mxu0 %v1851_v8  ;;  %303 = vmatpush1.bf16.msra.mxu1 %v1872_v15  ;;  %v1931_v34 = vld [vmem:[#allocation7 + $0xec] ss:$16 sps:$4 sm:$0xff]   ;;  %v896_v35 = vsel %vm1406_vm2, 1, %v1768_v0  ;;  %v1937_v36 = vld [vmem:[#allocation7 + $0xe8] ss:$16 sps:$4 sm:$0xff]   ;;  %v1160_v38 = vsel %vm1414_vm3, 1, %v1768_v0 }
  0x34   :  { %263 = vmatprep.subr.bf16.mxu0 %v1855_v9  ;;  %304 = vmatprep.subr.bf16.mxu1 %v1875_v16  ;;  %v90_v39 = vld [vmem:[#allocation4] sm:$0xff]  ;;  %v91_v43 = vld [vmem:[#allocation4 + $0x8] sm:$0xff]  ;;  %vm1398_vm6 = vcmp.gt.s32.totalorder %v1904_v25, 2  ;;  %vm1402_vm7 = vcmp.gt.s32.totalorder %v1904_v25, 3  ;;  %vm1410_vm8 = vcmp.gt.s32.totalorder %v1904_v25, 5  ;;  %vm1418_vm9 = vcmp.gt.s32.totalorder %v1904_v25, 7 }
  0x35   :  { %v92_v40 = vunpack.c.l.bf16 %v90_v39  ;;  %v93_v41 = vunpack.c.h.bf16 %v90_v39  ;;  %v94_v50 = vunpack.c.l.bf16 %v91_v43  ;;  %v95_v56 = vunpack.c.h.bf16 %v91_v43  ;;  %s1328_s19 = sshll.u32 %s1770_s1, 4  ;;  %s1771_s20 = smov [#allocation9]   ;;  %s1329_s19 = int_to_ptr.vmem [resolvable:$true] %s1328_s19 }
  0x36   :  { %502 = vperm.xlu0 %1436, %v500_v31   ;;  %s1315_s21 = sshll.u32 %s1771_s20, 4  ;;  %s1772_s22 = smov [#allocation12]   ;;  %s2297_s21 = int_to_ptr.vmem [resolvable:$true] %s1315_s21 }
  0x37   :  { %264 = vmatpush1.bf16.msra.mxu0 %v1864_v12  ;;  %305 = vmatpush1.bf16.msra.mxu1 %v1884_v19  ;;  %s1338_s23 = sshll.u32 %s1772_s22, 4  ;;  %s1690_s24 = scalar_lea.vmem %s1329_s19, 128  ;;  %s2299_s23 = int_to_ptr.vmem [resolvable:$true] %s1338_s23 }
  0x38   :  { %265 = vmatprep.subr.bf16.mxu0 %v1866_v13  ;;  %306 = vmatprep.subr.bf16.mxu1 %v1887_v20  ;;  %p1691_p2 = scmp.ne.s32.totalorder %s1329_s19, %s1690_s24  ;;  %p1695_p3 = scmp.lt.s32.totalorder %s1329_s19, %s1329_s19 }
  0x39   :  { %p1696_p4 = scmp.lt.s32.totalorder %s1690_s24, %s1690_s24 }
  0x3a   :  { %898 = vperm.xlu0 %1436, %v896_v35  }
  0x3b   :  { %266 = vmatpush1.bf16.msra.mxu0 %v1878_v17  ;;  %307 = vmatpush1.bf16.msra.mxu1 %v1896_v23  ;;  %p1697_p5 = por %p1696_p4, %p1695_p3 }
  0x3c   :  { %267 = vmatprep.subr.bf16.mxu0 %v1881_v18  ;;  %308 = vmatprep.subr.bf16.mxu1 %v1899_v24 }
  0x3d   :  { %p1698_p6 = pnand %p1697_p5, %p1691_p2 }
  0x3e   :  { %1162 = vperm.xlu0 %1436, %v1160_v38  }
  0x3f   :  { %268 = vmatpush1.bf16.msra.mxu0 %v1890_v21  ;;  %309 = vmatpush1.bf16.msra.mxu1 %v1916_v29 }
  0x40   :  { %269 = vmatprep.subr.bf16.mxu0 %v1892_v22  ;;  %310 = vmatprep.subr.bf16.mxu1 %v1919_v30 }
  0x43   :  { %270 = vmatpush1.bf16.msra.mxu0 %v1908_v26  ;;  %311 = vmatpush1.bf16.msra.mxu1 %v1928_v33 }
  0x44   :  { %271 = vmatprep.subr.bf16.mxu0 %v1913_v28  ;;  %312 = vmatprep.subr.bf16.mxu1 %v1931_v34 }
  0x47   :  { %272 = vmatpush1.bf16.msra.mxu0 %v1923_v32  ;;  %313 = vmatpush1.bf16.msra.mxu1 %v1937_v36 }
  0x48   :  { %387 = vmatprep.subr.bf16.mxu0 %v1833_v1  ;;  %428 = vmatprep.subr.bf16.mxu1 %v1846_v6 }
  0x4a   :  { %290 = vmatmul.mubr.bf16.vlgmr.msra.gmra.mrb[0].mxu0 %v1769_v37  ;;  %331 = vmatmul.mubr.bf16.vlgmr.msra.gmra.mrb[0].mxu1 %v1769_v37 }
  0x4b   :  { %388 = vmatpush1.bf16.msra.mxu0 %v1835_v2  ;;  %419 = vmatprep.mubr.bf16.mxu0 %v1768_v0 }
  0x4c   :  { %389 = vmatprep.subr.bf16.mxu0 %v1838_v3  ;;  %429 = vmatpush1.bf16.msra.mxu1 %v1848_v7 }
  0x4d   :  { %430 = vmatprep.subr.bf16.mxu1 %v1858_v10  ;;  %460 = vmatprep.mubr.bf16.mxu1 %v1768_v0 }
  0x4f   :  { %390 = vmatpush1.bf16.msra.mxu0 %v1841_v4 }
  0x50   :  { %391 = vmatprep.subr.bf16.mxu0 %v1844_v5  ;;  %431 = vmatpush1.bf16.msra.mxu1 %v1860_v11 }
  0x51   :  { %432 = vmatprep.subr.bf16.mxu1 %v1868_v14 }
  0x53   :  { %392 = vmatpush1.bf16.msra.mxu0 %v1851_v8 }
  0x54   :  { %393 = vmatprep.subr.bf16.mxu0 %v1855_v9  ;;  %433 = vmatpush1.bf16.msra.mxu1 %v1872_v15 }
  0x55   :  { %434 = vmatprep.subr.bf16.mxu1 %v1875_v16 }
  0x57   :  { %394 = vmatpush1.bf16.msra.mxu0 %v1864_v12 }
  0x58   :  { %395 = vmatprep.subr.bf16.mxu0 %v1866_v13  ;;  %435 = vmatpush1.bf16.msra.mxu1 %v1884_v19 }
  0x59   :  { %436 = vmatprep.subr.bf16.mxu1 %v1887_v20 }
  0x5b   :  { %396 = vmatpush1.bf16.msra.mxu0 %v1878_v17 }
  0x5c   :  { %397 = vmatprep.subr.bf16.mxu0 %v1881_v18  ;;  %437 = vmatpush1.bf16.msra.mxu1 %v1896_v23 }
  0x5d   :  { %438 = vmatprep.subr.bf16.mxu1 %v1899_v24 }
  0x5f   :  { %398 = vmatpush1.bf16.msra.mxu0 %v1890_v21 }
  0x60   :  { %399 = vmatprep.subr.bf16.mxu0 %v1892_v22  ;;  %439 = vmatpush1.bf16.msra.mxu1 %v1916_v29 }
  0x61   :  { %440 = vmatprep.subr.bf16.mxu1 %v1919_v30 }
  0x63   :  { %400 = vmatpush1.bf16.msra.mxu0 %v1908_v26 }
  0x64   :  { %401 = vmatprep.subr.bf16.mxu0 %v1913_v28  ;;  %441 = vmatpush1.bf16.msra.mxu1 %v1928_v33 }
  0x65   :  { %442 = vmatprep.subr.bf16.mxu1 %v1931_v34 }
  0x67   :  { %402 = vmatpush1.bf16.msra.mxu0 %v1923_v32 }
  0x68   :  { %519 = vmatprep.subr.bf16.mxu0 %v1833_v1  ;;  %443 = vmatpush1.bf16.msra.mxu1 %v1937_v36 }
  0x69   :  { %560 = vmatprep.subr.bf16.mxu1 %v1846_v6 }
  0xb1   :  { %v1981_v43 = vpop.permute.xlu0 %371 }
  0xb2   :  { %vm373_vm4 = vcmp.eq.s32.totalorder %v1981_v43, 1  ;;  %v512_v43 = vld [vmem:[#allocation4 + $0x20] sm:$0xff] }
  0xb3   :  { %vm1419_vm5 = vmpackc.low %vm373_vm4, %vm373_vm4 }
 0x11d   :  { %v291_v42 = vpop.f32.mrb[0].mxu0  ;;  %v332_v52 = vpop.f32.mrb[0].mxu1 }
 0x11e   :  { %v339_v44 = vadd.f32 %v291_v42, %v92_v40  ;;  %v293_v45 = vpop.f32.mrb[1].mxu0  ;;  %v334_v53 = vpop.f32.mrb[1].mxu1  ;;  %v341_v54 = vadd.f32 %v332_v52, %v94_v50  ;;  %v764_v50 = vsel %vm1402_vm7, 1, %v1768_v0  ;;  %v1292_v52 = vsel %vm1418_vm9, 1, %v1768_v0 }
 0x11f   :  { %v340_v46 = vadd.f32 %v293_v45, %v93_v41  ;;  %v295_v47 = vpop.f32.mrb[2].mxu0  ;;  %v336_v55 = vpop.f32.mrb[2].mxu1  ;;  %v342_v59 = vadd.f32 %v334_v53, %v95_v56  ;;  %v380_v53 = vld [vmem:[#allocation4 + $0x10] sm:$0xff] }
 0x120   :  { %v1387_v48 = vmul.f32 -1.442695, %v339_v44  ;;  %v296_v49 = vpop.f32.mrb[3].mxu0  ;;  %v337_v57 = vpop.f32.mrb[3].mxu1  ;;  %v1389_v58 = vmul.f32 -1.442695, %v341_v54  ;;  %v382_v54 = vunpack.c.l.bf16 %v380_v53  ;;  %v383_v55 = vunpack.c.h.bf16 %v380_v53 }
 0x121   :  { %v1388_v51 = vmul.f32 -1.442695, %v340_v46  ;;  %v632_v49 = vsel %vm1398_vm6, 1, %v1768_v0 }
 0x122   :  { %1486 = vpow2.f32 %v1387_v48  ;;  %634 = vperm.xlu1 %1437, %v632_v49  }
 0x123   :  { %1488 = vpow2.f32 %v1388_v51  ;;  %v1028_v51 = vsel %vm1410_vm8, 1, %v1768_v0 }
 0x124   :  { %1490 = vpow2.f32 %v1389_v58 }
 0x125   :  { %1492 = vtanh.f32 %v342_v59 }
 0x126   :  { %766 = vperm.xlu1 %1437, %v764_v50  }
 0x12a   :  { %1030 = vperm.xlu1 %1437, %v1028_v51  }
 0x12c   :  { %v1487_v60 = vpop.eup %1486 }
 0x12d   :  { %v1489_v61 = vpop.eup %1488  ;;  %v352_v62 = vadd.f32 1.0, %v1487_v60 }
 0x12e   :  { %v353_v63 = vadd.f32 1.0, %v1489_v61  ;;  %v1491_v27 = vpop.eup %1490  ;;  %1294 = vperm.xlu1 %1437, %v1292_v52   ;;  %v381_v61 = vld [vmem:[#allocation4 + $0x18] sm:$0xff] }
 0x12f   :  { %1494 = vrcp.f32 %v352_v62  ;;  %v1493_v31 = vpop.eup %1492  ;;  %v354_v37 = vadd.f32 1.0, %v1491_v27 }
 0x130   :  { %1496 = vrcp.f32 %v353_v63 }
 0x131   :  { %1498 = vrcp.f32 %v354_v37 }
 0x139   :  { %v1495_v35 = vpop.eup %1494 }
 0x13a   :  { %v1497_v38 = vpop.eup %1496  ;;  %v363_v39 = vmul.f32 %v1495_v35, %v1493_v31 }
 0x13b   :  { %v362_v40 = vmul.f32 0.0, %v1497_v38  ;;  %v1499_v42 = vpop.eup %1498  ;;  %v384_v38 = vunpack.c.l.bf16 %v381_v61 }
 0x13d   :  { %v1978_v41 = vadd.f32 %v363_v39, %v362_v40  ;;  %v385_v39 = vunpack.c.h.bf16 %v381_v61 }
 0x13f   :  { %1500 = vtanh.f32 %v1978_v41 }
 0x149   :  { %v1501_v44 = vpop.eup %1500 }
 0x14a   :  { %v366_v45 = vmul.f32 %v1501_v44, %v1499_v42 }
 0x14c   :  { %v1989_v46 = vsel %vm373_vm4, %v366_v45, 0.0  ;;  %v1420_v47 = vpack.c.bf16 %v366_v45, %v366_v45 }
 0x14d   :  { %v375_v48 = vpack.c.bf16 %v1989_v46, %v1989_v46 }
 0x14e   :  { %1421 = vmatmul.mubr.msk.bf16.vlgmr.msra.gmra.mrb[4].mxu0 %vm1419_vm5, %v1420_v47  ;;  %1424 = vmatmul.mubr.msk.bf16.vlgmr.msra.gmra.mrb[4].mxu1 %vm1419_vm5, %v1420_v47 }
 0x14f   :  { %376 = vst [vmem:[#allocation9] sm:$0xf] %v375_v48  ;;  %520 = vmatpush1.bf16.msra.mxu0 %v1835_v2  ;;  %561 = vmatpush1.bf16.msra.mxu1 %v1848_v7 }
 0x150   :  { %521 = vmatprep.subr.bf16.mxu0 %v1838_v3  ;;  %562 = vmatprep.subr.bf16.mxu1 %v1858_v10 }
 0x151   :  { %551 = vmatprep.mubr.bf16.mxu0 %v1768_v0  ;;  %592 = vmatprep.mubr.bf16.mxu1 %v1768_v0 }
 0x153   :  { %522 = vmatpush1.bf16.msra.mxu0 %v1841_v4  ;;  %563 = vmatpush1.bf16.msra.mxu1 %v1860_v11 }
 0x154   :  { %523 = vmatprep.subr.bf16.mxu0 %v1844_v5  ;;  %564 = vmatprep.subr.bf16.mxu1 %v1868_v14 }
 0x157   :  { %524 = vmatpush1.bf16.msra.mxu0 %v1851_v8  ;;  %565 = vmatpush1.bf16.msra.mxu1 %v1872_v15 }
 0x158   :  { %525 = vmatprep.subr.bf16.mxu0 %v1855_v9  ;;  %566 = vmatprep.subr.bf16.mxu1 %v1875_v16 }
 0x15b   :  { %526 = vmatpush1.bf16.msra.mxu0 %v1864_v12  ;;  %567 = vmatpush1.bf16.msra.mxu1 %v1884_v19 }
 0x15c   :  { %527 = vmatprep.subr.bf16.mxu0 %v1866_v13  ;;  %568 = vmatprep.subr.bf16.mxu1 %v1887_v20 }
 0x15f   :  { %528 = vmatpush1.bf16.msra.mxu0 %v1878_v17  ;;  %569 = vmatpush1.bf16.msra.mxu1 %v1896_v23 }
 0x160   :  { %529 = vmatprep.subr.bf16.mxu0 %v1881_v18  ;;  %570 = vmatprep.subr.bf16.mxu1 %v1899_v24 }
 0x163   :  { %530 = vmatpush1.bf16.msra.mxu0 %v1890_v21  ;;  %571 = vmatpush1.bf16.msra.mxu1 %v1916_v29 }
 0x164   :  { %531 = vmatprep.subr.bf16.mxu0 %v1892_v22  ;;  %572 = vmatprep.subr.bf16.mxu1 %v1919_v30 }
 0x167   :  { %532 = vmatpush1.bf16.msra.mxu0 %v1908_v26  ;;  %573 = vmatpush1.bf16.msra.mxu1 %v1928_v33 }
 0x168   :  { %533 = vmatprep.subr.bf16.mxu0 %v1913_v28  ;;  %574 = vmatprep.subr.bf16.mxu1 %v1931_v34 }
 0x16b   :  { %534 = vmatpush1.bf16.msra.mxu0 %v1923_v32  ;;  %575 = vmatpush1.bf16.msra.mxu1 %v1937_v36 }
 0x16c   :  { %651 = vmatprep.subr.bf16.mxu0 %v1833_v1  ;;  %692 = vmatprep.subr.bf16.mxu1 %v1846_v6 }
 0x221   :  { %v421_v56 = vpop.f32.mrb[4].mxu0  ;;  %v462_v57 = vpop.f32.mrb[4].mxu1 }
 0x222   :  { %v469_v58 = vadd.f32 %v421_v56, %v382_v54  ;;  %v423_v59 = vpop.f32.mrb[5].mxu0  ;;  %v464_v60 = vpop.f32.mrb[5].mxu1  ;;  %v471_v40 = vadd.f32 %v462_v57, %v384_v38 }
 0x223   :  { %v470_v62 = vadd.f32 %v423_v59, %v383_v55  ;;  %v425_v63 = vpop.f32.mrb[6].mxu0  ;;  %v466_v27 = vpop.f32.mrb[6].mxu1  ;;  %v472_v42 = vadd.f32 %v464_v60, %v385_v39  ;;  %v378_v55 = vsel %vm373_vm4, %v1978_v41, 0.0 }
 0x224   :  { %v1391_v31 = vmul.f32 -1.442695, %v469_v58  ;;  %v426_v35 = vpop.f32.mrb[7].mxu0  ;;  %v467_v37 = vpop.f32.mrb[7].mxu1  ;;  %v1393_v44 = vmul.f32 -1.442695, %v471_v40 }
 0x225   :  { %v1392_v25 = vmul.f32 -1.442695, %v470_v62  ;;  %v503_v58 = vpop.permute.xlu0 %502  ;;  %v515_v37 = vunpack.c.h.bf16 %v512_v43 }
 0x226   :  { %1502 = vpow2.f32 %v1391_v31  ;;  %vm504_vm10 = vcmp.eq.s32.totalorder %v503_v58, 1 }
 0x227   :  { %1504 = vpow2.f32 %v1392_v25 }
 0x228   :  { %1506 = vtanh.f32 %v472_v42 }
 0x229   :  { %1508 = vpow2.f32 %v1393_v44  ;;  %v513_v44 = vld [vmem:[#allocation4 + $0x28] sm:$0xff] }
 0x230   :  { %v1503_v45 = vpop.eup %1502 }
 0x231   :  { %v482_v47 = vadd.f32 1.0, %v1503_v45  ;;  %v1505_v48 = vpop.eup %1504 }
 0x232   :  { %v483_v49 = vadd.f32 1.0, %v1505_v48  ;;  %v1507_v50 = vpop.eup %1506 }
 0x233   :  { %1510 = vrcp.f32 %v482_v47  ;;  %v1509_v51 = vpop.eup %1508 }
 0x234   :  { %1512 = vrcp.f32 %v483_v49  ;;  %v484_v56 = vadd.f32 1.0, %v1509_v51 }
 0x236   :  { %1514 = vrcp.f32 %v484_v56 }
 0x23d   :  { %v1511_v52 = vpop.eup %1510 }
 0x23e   :  { %v493_v53 = vmul.f32 %v1511_v52, %v1507_v50  ;;  %v1513_v54 = vpop.eup %1512 }
 0x23f   :  { %v492_v57 = vmul.f32 %v1513_v54, %v378_v55  ;;  %v517_v54 = vunpack.c.h.bf16 %v513_v44 }
 0x240   :  { %v1515_v61 = vpop.eup %1514 }
 0x241   :  { %v494_v59 = vadd.f32 %v493_v53, %v492_v57  ;;  %v516_v53 = vunpack.c.l.bf16 %v513_v44 }
 0x243   :  { %1516 = vtanh.f32 %v494_v59  ;;  %v2038_v60 = vsel %vm504_vm10, %v494_v59, %v378_v55 }
 0x24d   :  { %v1517_v62 = vpop.eup %1516 }
 0x24e   :  { %v496_v63 = vmul.f32 %v1517_v62, %v1515_v61 }
 0x250   :  { %v505_v27 = vsel %vm504_vm10, %v496_v63, 0.0  ;;  %v2041_v31 = vsel %vm504_vm10, %v496_v63, %v1989_v46  ;;  %v514_v46 = vunpack.c.l.bf16 %v512_v43 }
 0x251   :  { %v506_v35 = vpack.c.bf16 %v505_v27, %v505_v27  ;;  %v518_v41 = vpack.c.bf16 %v2041_v31, %v2041_v31 }
 0x253   :  { %508 = vst [vmem:[#allocation9 + $0x4] sm:$0xf] %v506_v35  ;;  %552 = vmatmul.mubr.bf16.vlgmr.msra.gmra.mrb[8].mxu0 %v518_v41  ;;  %593 = vmatmul.mubr.bf16.vlgmr.msra.gmra.mrb[8].mxu1 %v518_v41  ;;  %v635_v41 = vpop.permute.xlu1 %634 }
 0x254   :  { %652 = vmatpush1.bf16.msra.mxu0 %v1835_v2  ;;  %693 = vmatpush1.bf16.msra.mxu1 %v1848_v7  ;;  %vm636_vm11 = vcmp.eq.s32.totalorder %v635_v41, 1 }
 0x255   :  { %653 = vmatprep.subr.bf16.mxu0 %v1838_v3  ;;  %694 = vmatprep.subr.bf16.mxu1 %v1858_v10 }
 0x256   :  { %683 = vmatprep.mubr.bf16.mxu0 %v1768_v0  ;;  %724 = vmatprep.mubr.bf16.mxu1 %v1768_v0 }
 0x258   :  { %654 = vmatpush1.bf16.msra.mxu0 %v1841_v4  ;;  %695 = vmatpush1.bf16.msra.mxu1 %v1860_v11 }
 0x259   :  { %655 = vmatprep.subr.bf16.mxu0 %v1844_v5  ;;  %696 = vmatprep.subr.bf16.mxu1 %v1868_v14 }
 0x25c   :  { %656 = vmatpush1.bf16.msra.mxu0 %v1851_v8  ;;  %697 = vmatpush1.bf16.msra.mxu1 %v1872_v15 }
 0x25d   :  { %657 = vmatprep.subr.bf16.mxu0 %v1855_v9  ;;  %698 = vmatprep.subr.bf16.mxu1 %v1875_v16 }
 0x260   :  { %658 = vmatpush1.bf16.msra.mxu0 %v1864_v12  ;;  %699 = vmatpush1.bf16.msra.mxu1 %v1884_v19 }
 0x261   :  { %659 = vmatprep.subr.bf16.mxu0 %v1866_v13  ;;  %700 = vmatprep.subr.bf16.mxu1 %v1887_v20 }
 0x264   :  { %660 = vmatpush1.bf16.msra.mxu0 %v1878_v17  ;;  %701 = vmatpush1.bf16.msra.mxu1 %v1896_v23 }
 0x265   :  { %661 = vmatprep.subr.bf16.mxu0 %v1881_v18  ;;  %702 = vmatprep.subr.bf16.mxu1 %v1899_v24 }
 0x268   :  { %662 = vmatpush1.bf16.msra.mxu0 %v1890_v21  ;;  %703 = vmatpush1.bf16.msra.mxu1 %v1916_v29 }
 0x269   :  { %663 = vmatprep.subr.bf16.mxu0 %v1892_v22  ;;  %704 = vmatprep.subr.bf16.mxu1 %v1919_v30 }
 0x26c   :  { %664 = vmatpush1.bf16.msra.mxu0 %v1908_v26  ;;  %705 = vmatpush1.bf16.msra.mxu1 %v1928_v33 }
 0x26d   :  { %665 = vmatprep.subr.bf16.mxu0 %v1913_v28  ;;  %706 = vmatprep.subr.bf16.mxu1 %v1931_v34 }
 0x270   :  { %666 = vmatpush1.bf16.msra.mxu0 %v1923_v32  ;;  %707 = vmatpush1.bf16.msra.mxu1 %v1937_v36 }
 0x271   :  { %783 = vmatprep.subr.bf16.mxu0 %v1833_v1  ;;  %824 = vmatprep.subr.bf16.mxu1 %v1846_v6 }
 0x326   :  { %v553_v25 = vpop.f32.mrb[8].mxu0  ;;  %v594_v38 = vpop.f32.mrb[8].mxu1 }
 0x327   :  { %v601_v39 = vadd.f32 %v553_v25, %v514_v46  ;;  %v555_v40 = vpop.f32.mrb[9].mxu0  ;;  %v596_v42 = vpop.f32.mrb[9].mxu1  ;;  %v603_v55 = vadd.f32 %v594_v38, %v516_v53 }
 0x328   :  { %v602_v45 = vadd.f32 %v555_v40, %v515_v37  ;;  %v557_v47 = vpop.f32.mrb[10].mxu0  ;;  %v598_v48 = vpop.f32.mrb[10].mxu1  ;;  %v604_v56 = vadd.f32 %v596_v42, %v517_v54 }
 0x329   :  { %v1395_v49 = vmul.f32 -1.442695, %v601_v39  ;;  %v558_v50 = vpop.f32.mrb[11].mxu0  ;;  %v599_v51 = vpop.f32.mrb[11].mxu1  ;;  %v1397_v57 = vmul.f32 -1.442695, %v603_v55 }
 0x32a   :  { %v1396_v52 = vmul.f32 -1.442695, %v602_v45 }
 0x32b   :  { %1518 = vpow2.f32 %v1395_v49 }
 0x32c   :  { %1520 = vpow2.f32 %v1396_v52 }
 0x32d   :  { %1522 = vtanh.f32 %v604_v56  ;;  %v645_v56 = vld [vmem:[#allocation4 + $0x38] sm:$0xff] }
 0x32e   :  { %1524 = vpow2.f32 %v1397_v57  ;;  %v649_v41 = vunpack.c.h.bf16 %v645_v56 }
 0x335   :  { %v1519_v58 = vpop.eup %1518 }
 0x336   :  { %v614_v59 = vadd.f32 1.0, %v1519_v58  ;;  %v1521_v61 = vpop.eup %1520 }
 0x337   :  { %v615_v62 = vadd.f32 1.0, %v1521_v61  ;;  %v1523_v63 = vpop.eup %1522 }
 0x338   :  { %1526 = vrcp.f32 %v614_v59  ;;  %v1525_v27 = vpop.eup %1524 }
 0x339   :  { %1528 = vrcp.f32 %v615_v62  ;;  %v616_v37 = vadd.f32 1.0, %v1525_v27 }
 0x33b   :  { %1530 = vrcp.f32 %v616_v37 }
 0x342   :  { %v1527_v35 = vpop.eup %1526 }
 0x343   :  { %v625_v43 = vmul.f32 %v1527_v35, %v1523_v63  ;;  %v1529_v46 = vpop.eup %1528  ;;  %v648_v35 = vunpack.c.l.bf16 %v645_v56 }
 0x344   :  { %v624_v25 = vmul.f32 %v1529_v46, %v2038_v60 }
 0x345   :  { %v1531_v40 = vpop.eup %1530 }
 0x346   :  { %v626_v38 = vadd.f32 %v625_v43, %v624_v25 }
 0x348   :  { %1532 = vtanh.f32 %v626_v38  ;;  %v2081_v39 = vsel %vm636_vm11, %v626_v38, %v2038_v60  ;;  %v644_v60 = vld [vmem:[#allocation4 + $0x30] sm:$0xff] }
 0x349   :  { %v647_v50 = vunpack.c.h.bf16 %v644_v60 }
 0x352   :  { %v1533_v42 = vpop.eup %1532 }
 0x353   :  { %v628_v44 = vmul.f32 %v1533_v42, %v1531_v40 }
 0x355   :  { %v637_v45 = vsel %vm636_vm11, %v628_v44, 0.0  ;;  %v2084_v47 = vsel %vm636_vm11, %v628_v44, %v2041_v31  ;;  %v646_v31 = vunpack.c.l.bf16 %v644_v60 }
 0x356   :  { %v638_v48 = vpack.c.bf16 %v637_v45, %v637_v45  ;;  %v650_v49 = vpack.c.bf16 %v2084_v47, %v2084_v47 }
 0x358   :  { %640 = vst [vmem:[#allocation9 + $0x8] sm:$0xf] %v638_v48  ;;  %684 = vmatmul.mubr.bf16.vlgmr.msra.gmra.mrb[12].mxu0 %v650_v49  ;;  %725 = vmatmul.mubr.bf16.vlgmr.msra.gmra.mrb[12].mxu1 %v650_v49 }
 0x359   :  { %784 = vmatpush1.bf16.msra.mxu0 %v1835_v2  ;;  %825 = vmatpush1.bf16.msra.mxu1 %v1848_v7 }
 0x35a   :  { %785 = vmatprep.subr.bf16.mxu0 %v1838_v3  ;;  %826 = vmatprep.subr.bf16.mxu1 %v1858_v10 }
 0x35b   :  { %815 = vmatprep.mubr.bf16.mxu0 %v1768_v0  ;;  %856 = vmatprep.mubr.bf16.mxu1 %v1768_v0 }
 0x35d   :  { %786 = vmatpush1.bf16.msra.mxu0 %v1841_v4  ;;  %827 = vmatpush1.bf16.msra.mxu1 %v1860_v11 }
 0x35e   :  { %787 = vmatprep.subr.bf16.mxu0 %v1844_v5  ;;  %828 = vmatprep.subr.bf16.mxu1 %v1868_v14 }
 0x361   :  { %788 = vmatpush1.bf16.msra.mxu0 %v1851_v8  ;;  %829 = vmatpush1.bf16.msra.mxu1 %v1872_v15 }
 0x362   :  { %789 = vmatprep.subr.bf16.mxu0 %v1855_v9  ;;  %830 = vmatprep.subr.bf16.mxu1 %v1875_v16 }
 0x365   :  { %790 = vmatpush1.bf16.msra.mxu0 %v1864_v12  ;;  %831 = vmatpush1.bf16.msra.mxu1 %v1884_v19 }
 0x366   :  { %791 = vmatprep.subr.bf16.mxu0 %v1866_v13  ;;  %832 = vmatprep.subr.bf16.mxu1 %v1887_v20 }
 0x369   :  { %792 = vmatpush1.bf16.msra.mxu0 %v1878_v17  ;;  %833 = vmatpush1.bf16.msra.mxu1 %v1896_v23 }
 0x36a   :  { %793 = vmatprep.subr.bf16.mxu0 %v1881_v18  ;;  %834 = vmatprep.subr.bf16.mxu1 %v1899_v24 }
 0x36d   :  { %794 = vmatpush1.bf16.msra.mxu0 %v1890_v21  ;;  %835 = vmatpush1.bf16.msra.mxu1 %v1916_v29 }
 0x36e   :  { %795 = vmatprep.subr.bf16.mxu0 %v1892_v22  ;;  %836 = vmatprep.subr.bf16.mxu1 %v1919_v30 }
 0x371   :  { %796 = vmatpush1.bf16.msra.mxu0 %v1908_v26  ;;  %837 = vmatpush1.bf16.msra.mxu1 %v1928_v33 }
 0x372   :  { %797 = vmatprep.subr.bf16.mxu0 %v1913_v28  ;;  %838 = vmatprep.subr.bf16.mxu1 %v1931_v34 }
 0x375   :  { %798 = vmatpush1.bf16.msra.mxu0 %v1923_v32  ;;  %839 = vmatpush1.bf16.msra.mxu1 %v1937_v36 }
 0x376   :  { %915 = vmatprep.subr.bf16.mxu0 %v1833_v1  ;;  %956 = vmatprep.subr.bf16.mxu1 %v1846_v6 }
 0x42b   :  { %v685_v51 = vpop.f32.mrb[12].mxu0  ;;  %v726_v52 = vpop.f32.mrb[12].mxu1 }
 0x42c   :  { %v733_v53 = vadd.f32 %v685_v51, %v646_v31  ;;  %v687_v54 = vpop.f32.mrb[13].mxu0  ;;  %v728_v55 = vpop.f32.mrb[13].mxu1  ;;  %v735_v43 = vadd.f32 %v726_v52, %v648_v35 }
 0x42d   :  { %v734_v57 = vadd.f32 %v687_v54, %v647_v50  ;;  %v689_v58 = vpop.f32.mrb[14].mxu0  ;;  %v730_v59 = vpop.f32.mrb[14].mxu1  ;;  %v736_v46 = vadd.f32 %v728_v55, %v649_v41 }
 0x42e   :  { %v1399_v61 = vmul.f32 -1.442695, %v733_v53  ;;  %v690_v62 = vpop.f32.mrb[15].mxu0  ;;  %v731_v63 = vpop.f32.mrb[15].mxu1  ;;  %v1401_v37 = vmul.f32 -1.442695, %v735_v43 }
 0x42f   :  { %v1400_v27 = vmul.f32 -1.442695, %v734_v57  ;;  %v767_v51 = vpop.permute.xlu1 %766  ;;  %v899_v43 = vpop.permute.xlu0 %898 }
 0x430   :  { %1534 = vpow2.f32 %v1399_v61  ;;  %vm768_vm12 = vcmp.eq.s32.totalorder %v767_v51, 1  ;;  %vm900_vm13 = vcmp.eq.s32.totalorder %v899_v43, 1  ;;  %v2188_v51 = vld [vmem:[#allocation7 + $0x20] ss:$16 sps:$4 sm:$0xff]  }
 0x431   :  { %1536 = vpow2.f32 %v1400_v27 }
 0x432   :  { %1538 = vtanh.f32 %v736_v46 }
 0x433   :  { %1540 = vpow2.f32 %v1401_v37 }
 0x43a   :  { %v1535_v25 = vpop.eup %1534 }
 0x43b   :  { %v746_v38 = vadd.f32 1.0, %v1535_v25  ;;  %v1537_v40 = vpop.eup %1536 }
 0x43c   :  { %v747_v42 = vadd.f32 1.0, %v1537_v40  ;;  %v1539_v44 = vpop.eup %1538 }
 0x43d   :  { %1542 = vrcp.f32 %v746_v38  ;;  %v1541_v45 = vpop.eup %1540 }
 0x43e   :  { %1544 = vrcp.f32 %v747_v42  ;;  %v748_v31 = vadd.f32 1.0, %v1541_v45 }
 0x440   :  { %1546 = vrcp.f32 %v748_v31  ;;  %v2180_v31 = vld [vmem:[#allocation7 + $0x24] ss:$16 sps:$4 sm:$0xff]  }
 0x447   :  { %v1543_v48 = vpop.eup %1542 }
 0x448   :  { %v757_v49 = vmul.f32 %v1543_v48, %v1539_v44  ;;  %v1545_v60 = vpop.eup %1544 }
 0x449   :  { %v756_v50 = vmul.f32 %v1545_v60, %v2081_v39  ;;  %v2177_v60 = vld [vmem:[#allocation7 + $0x8] ss:$16 sps:$4 sm:$0xff]  }
 0x44a   :  { %v1547_v54 = vpop.eup %1546 }
 0x44b   :  { %v758_v52 = vadd.f32 %v757_v49, %v756_v50  ;;  %v2174_v49 = vld [vmem:[#allocation7] ss:$16 sps:$4 sm:$0xff]   ;;  %v2183_v50 = vld [vmem:[#allocation7 + $0x2c] ss:$16 sps:$4 sm:$0xff]  }
 0x44d   :  { %1548 = vtanh.f32 %v758_v52  ;;  %v2124_v53 = vsel %vm768_vm12, %v758_v52, %v2081_v39  ;;  %v2191_v52 = vld [vmem:[#allocation7 + $0x28] ss:$16 sps:$4 sm:$0xff]  }
 0x457   :  { %v1549_v55 = vpop.eup %1548 }
 0x458   :  { %v760_v56 = vmul.f32 %v1549_v55, %v1547_v54  ;;  %v2197_v54 = vld [vmem:[#allocation7 + $0x4c] ss:$16 sps:$4 sm:$0xff]   ;;  %v2200_v55 = vld [vmem:[#allocation7 + $0x40] ss:$16 sps:$4 sm:$0xff]  }
 0x45a   :  { %v769_v57 = vsel %vm768_vm12, %v760_v56, 0.0  ;;  %v2127_v58 = vsel %vm768_vm12, %v760_v56, %v2084_v47  ;;  %v2203_v56 = vld [vmem:[#allocation7 + $0x48] ss:$16 sps:$4 sm:$0xff]  }
 0x45b   :  { %v770_v59 = vpack.c.bf16 %v769_v57, %v769_v57  ;;  %v782_v61 = vpack.c.bf16 %v2127_v58, %v2127_v58  ;;  %v2206_v57 = vld [vmem:[#allocation7 + $0x64] ss:$16 sps:$4 sm:$0xff]  }
 0x45d   :  { %772 = vst [vmem:[#allocation9 + $0xc] sm:$0xf] %v770_v59  ;;  %816 = vmatmul.mubr.bf16.vlgmr.msra.gmra.mrb[16].mxu0 %v782_v61  ;;  %857 = vmatmul.mubr.bf16.vlgmr.msra.gmra.mrb[16].mxu1 %v782_v61  ;;  %v2212_v59 = vld [vmem:[#allocation7 + $0x60] ss:$16 sps:$4 sm:$0xff]   ;;  %v2215_v61 = vld [vmem:[#allocation7 + $0x68] ss:$16 sps:$4 sm:$0xff]  }
 0x45e   :  { %916 = vmatpush1.bf16.msra.mxu0 %v1835_v2  ;;  %957 = vmatpush1.bf16.msra.mxu1 %v1848_v7  ;;  %v776_v2 = vld [vmem:[#allocation4 + $0x40] sm:$0xff] }
 0x45f   :  { %917 = vmatprep.subr.bf16.mxu0 %v1838_v3  ;;  %958 = vmatprep.subr.bf16.mxu1 %v1858_v10  ;;  %v778_v3 = vunpack.c.l.bf16 %v776_v2 }
 0x460   :  { %947 = vmatprep.mubr.bf16.mxu0 %v1768_v0  ;;  %988 = vmatprep.mubr.bf16.mxu1 %v1768_v0 }
 0x462   :  { %918 = vmatpush1.bf16.msra.mxu0 %v1841_v4  ;;  %959 = vmatpush1.bf16.msra.mxu1 %v1860_v11  ;;  %v779_v4 = vunpack.c.h.bf16 %v776_v2  ;;  %v777_v11 = vld [vmem:[#allocation4 + $0x48] sm:$0xff]  ;;  %v2218_v2 = vld [vmem:[#allocation7 + $0x84] ss:$16 sps:$4 sm:$0xff]  }
 0x463   :  { %919 = vmatprep.subr.bf16.mxu0 %v1844_v5  ;;  %960 = vmatprep.subr.bf16.mxu1 %v1868_v14 }
 0x466   :  { %920 = vmatpush1.bf16.msra.mxu0 %v1851_v8  ;;  %961 = vmatpush1.bf16.msra.mxu1 %v1872_v15 }
 0x467   :  { %921 = vmatprep.subr.bf16.mxu0 %v1855_v9  ;;  %962 = vmatprep.subr.bf16.mxu1 %v1875_v16 }
 0x46a   :  { %922 = vmatpush1.bf16.msra.mxu0 %v1864_v12  ;;  %963 = vmatpush1.bf16.msra.mxu1 %v1884_v19 }
 0x46b   :  { %923 = vmatprep.subr.bf16.mxu0 %v1866_v13  ;;  %964 = vmatprep.subr.bf16.mxu1 %v1887_v20 }
 0x46e   :  { %924 = vmatpush1.bf16.msra.mxu0 %v1878_v17  ;;  %965 = vmatpush1.bf16.msra.mxu1 %v1896_v23 }
 0x46f   :  { %925 = vmatprep.subr.bf16.mxu0 %v1881_v18  ;;  %966 = vmatprep.subr.bf16.mxu1 %v1899_v24 }
 0x472   :  { %926 = vmatpush1.bf16.msra.mxu0 %v1890_v21  ;;  %967 = vmatpush1.bf16.msra.mxu1 %v1916_v29 }
 0x473   :  { %927 = vmatprep.subr.bf16.mxu0 %v1892_v22  ;;  %968 = vmatprep.subr.bf16.mxu1 %v1919_v30 }
 0x476   :  { %928 = vmatpush1.bf16.msra.mxu0 %v1908_v26  ;;  %969 = vmatpush1.bf16.msra.mxu1 %v1928_v33 }
 0x477   :  { %929 = vmatprep.subr.bf16.mxu0 %v1913_v28  ;;  %970 = vmatprep.subr.bf16.mxu1 %v1931_v34 }
 0x47a   :  { %930 = vmatpush1.bf16.msra.mxu0 %v1923_v32  ;;  %971 = vmatpush1.bf16.msra.mxu1 %v1937_v36 }
 0x47b   :  { %1047 = vmatprep.subr.bf16.mxu0 %v1833_v1  ;;  %1088 = vmatprep.subr.bf16.mxu1 %v1846_v6  ;;  %v780_v1 = vunpack.c.l.bf16 %v777_v11  ;;  %v781_v6 = vunpack.c.h.bf16 %v777_v11  ;;  %v2244_v11 = vld [vmem:[#allocation7 + $0xc0] ss:$16 sps:$4 sm:$0xff]  }
 0x530   :  { %v817_v5 = vpop.f32.mrb[16].mxu0  ;;  %v858_v7 = vpop.f32.mrb[16].mxu1 }
 0x531   :  { %v865_v8 = vadd.f32 %v817_v5, %v778_v3  ;;  %v819_v9 = vpop.f32.mrb[17].mxu0  ;;  %v860_v10 = vpop.f32.mrb[17].mxu1  ;;  %v867_v19 = vadd.f32 %v858_v7, %v780_v1  ;;  %v2221_v3 = vld [vmem:[#allocation7 + $0x8c] ss:$16 sps:$4 sm:$0xff]   ;;  %v2227_v5 = vld [vmem:[#allocation7 + $0x88] ss:$16 sps:$4 sm:$0xff]  }
 0x532   :  { %v866_v12 = vadd.f32 %v819_v9, %v779_v4  ;;  %v821_v13 = vpop.f32.mrb[18].mxu0  ;;  %v862_v14 = vpop.f32.mrb[18].mxu1  ;;  %v868_v20 = vadd.f32 %v860_v10, %v781_v6  ;;  %v2224_v4 = vld [vmem:[#allocation7 + $0x80] ss:$16 sps:$4 sm:$0xff]   ;;  %v2230_v7 = vld [vmem:[#allocation7 + $0xa4] ss:$16 sps:$4 sm:$0xff]  }
 0x533   :  { %v1403_v15 = vmul.f32 -1.442695, %v865_v8  ;;  %v822_v16 = vpop.f32.mrb[19].mxu0  ;;  %v863_v17 = vpop.f32.mrb[19].mxu1  ;;  %v1405_v21 = vmul.f32 -1.442695, %v867_v19 }
 0x534   :  { %v1404_v18 = vmul.f32 -1.442695, %v866_v12  ;;  %v2233_v8 = vld [vmem:[#allocation7 + $0xac] ss:$16 sps:$4 sm:$0xff]   ;;  %v2236_v9 = vld [vmem:[#allocation7 + $0xa0] ss:$16 sps:$4 sm:$0xff]  }
 0x535   :  { %1550 = vpow2.f32 %v1403_v15  ;;  %v2240_v10 = vld [vmem:[#allocation7 + $0xc4] ss:$16 sps:$4 sm:$0xff]   ;;  %v1638_v12 = vld [vmem:[#allocation7 + $0xc] ss:$16 sps:$4 sm:$0xff]  }
 0x536   :  { %1552 = vpow2.f32 %v1404_v18  ;;  %v908_v13 = vld [vmem:[#allocation4 + $0x50] sm:$0xff]  ;;  %v909_v1 = vld [vmem:[#allocation4 + $0x58] sm:$0xff] }
 0x537   :  { %1554 = vtanh.f32 %v868_v20  ;;  %v911_v14 = vunpack.c.h.bf16 %v908_v13 }
 0x538   :  { %1556 = vpow2.f32 %v1405_v21  ;;  %v912_v21 = vunpack.c.l.bf16 %v909_v1 }
 0x53f   :  { %v1551_v22 = vpop.eup %1550 }
 0x540   :  { %v878_v23 = vadd.f32 1.0, %v1551_v22  ;;  %v1553_v24 = vpop.eup %1552  ;;  %v913_v22 = vunpack.c.h.bf16 %v909_v1 }
 0x541   :  { %v879_v26 = vadd.f32 1.0, %v1553_v24  ;;  %v1555_v39 = vpop.eup %1554 }
 0x542   :  { %1558 = vrcp.f32 %v878_v23  ;;  %v1557_v47 = vpop.eup %1556 }
 0x543   :  { %1560 = vrcp.f32 %v879_v26  ;;  %v880_v35 = vadd.f32 1.0, %v1557_v47 }
 0x545   :  { %1562 = vrcp.f32 %v880_v35 }
 0x54c   :  { %v1559_v62 = vpop.eup %1558 }
 0x54d   :  { %v889_v63 = vmul.f32 %v1559_v62, %v1555_v39  ;;  %v1561_v27 = vpop.eup %1560 }
 0x54e   :  { %v888_v41 = vmul.f32 %v1561_v27, %v2124_v53 }
 0x54f   :  { %v1563_v25 = vpop.eup %1562 }
 0x550   :  { %v890_v46 = vadd.f32 %v889_v63, %v888_v41 }
 0x552   :  { %1564 = vtanh.f32 %v890_v46  ;;  %v2167_v37 = vsel %vm900_vm13, %v890_v46, %v2124_v53  ;;  %v2194_v53 = vld [vmem:[#allocation7 + $0x44] ss:$16 sps:$4 sm:$0xff]  }
 0x55c   :  { %v1565_v38 = vpop.eup %1564 }
 0x55d   :  { %v892_v40 = vmul.f32 %v1565_v38, %v1563_v25 }
 0x55f   :  { %v901_v42 = vsel %vm900_vm13, %v892_v40, 0.0  ;;  %v2170_v44 = vsel %vm900_vm13, %v892_v40, %v2127_v58  ;;  %v2209_v58 = vld [vmem:[#allocation7 + $0x6c] ss:$16 sps:$4 sm:$0xff]   ;;  %v1031_v40 = vpop.permute.xlu1 %1030 }
 0x560   :  { %v902_v45 = vpack.c.bf16 %v901_v42, %v901_v42  ;;  %v914_v48 = vpack.c.bf16 %v2170_v44, %v2170_v44  ;;  %vm1032_vm14 = vcmp.eq.s32.totalorder %v1031_v40, 1 }
 0x562   :  { %904 = vst [vmem:[#allocation9 + $0x10] sm:$0xf] %v902_v45  ;;  %948 = vmatmul.mubr.bf16.vlgmr.msra.gmra.mrb[20].mxu0 %v914_v48  ;;  %989 = vmatmul.mubr.bf16.vlgmr.msra.gmra.mrb[20].mxu1 %v914_v48 }
 0x563   :  { %1048 = vmatpush1.bf16.msra.mxu0 %v2174_v49  ;;  %1089 = vmatpush1.bf16.msra.mxu1 %v2177_v60 }
 0x564   :  { %1049 = vmatprep.subr.bf16.mxu0 %v2180_v31  ;;  %1090 = vmatprep.subr.bf16.mxu1 %v2183_v50 }
 0x565   :  { %1079 = vmatprep.mubr.bf16.mxu0 %v1768_v0  ;;  %1120 = vmatprep.mubr.bf16.mxu1 %v1768_v0 }
 0x567   :  { %1050 = vmatpush1.bf16.msra.mxu0 %v2188_v51  ;;  %1091 = vmatpush1.bf16.msra.mxu1 %v2191_v52 }
 0x568   :  { %1051 = vmatprep.subr.bf16.mxu0 %v2194_v53  ;;  %1092 = vmatprep.subr.bf16.mxu1 %v2197_v54 }
 0x56b   :  { %1052 = vmatpush1.bf16.msra.mxu0 %v2200_v55  ;;  %1093 = vmatpush1.bf16.msra.mxu1 %v2203_v56 }
 0x56c   :  { %1053 = vmatprep.subr.bf16.mxu0 %v2206_v57  ;;  %1094 = vmatprep.subr.bf16.mxu1 %v2209_v58 }
 0x56f   :  { %1054 = vmatpush1.bf16.msra.mxu0 %v2212_v59  ;;  %1095 = vmatpush1.bf16.msra.mxu1 %v2215_v61 }
 0x570   :  { %1055 = vmatprep.subr.bf16.mxu0 %v2218_v2  ;;  %1096 = vmatprep.subr.bf16.mxu1 %v2221_v3 }
 0x573   :  { %1056 = vmatpush1.bf16.msra.mxu0 %v2224_v4  ;;  %1097 = vmatpush1.bf16.msra.mxu1 %v2227_v5 }
 0x574   :  { %1057 = vmatprep.subr.bf16.mxu0 %v2230_v7  ;;  %1098 = vmatprep.subr.bf16.mxu1 %v2233_v8 }
 0x577   :  { %1058 = vmatpush1.bf16.msra.mxu0 %v2236_v9  ;;  %1099 = vmatpush1.bf16.msra.mxu1 %v1916_v29  ;;  %v1637_v29 = vld [vmem:[#allocation7 + $0x4] ss:$16 sps:$4 sm:$0xff]  }
 0x578   :  { %1059 = vmatprep.subr.bf16.mxu0 %v2240_v10  ;;  %1100 = vmatprep.subr.bf16.mxu1 %v1919_v30  ;;  %v910_v30 = vunpack.c.l.bf16 %v908_v13 }
 0x57b   :  { %1060 = vmatpush1.bf16.msra.mxu0 %v2244_v11  ;;  %1101 = vmatpush1.bf16.msra.mxu1 %v1928_v33 }
 0x57c   :  { %1061 = vmatprep.subr.bf16.mxu0 %v1913_v28  ;;  %1102 = vmatprep.subr.bf16.mxu1 %v1931_v34 }
 0x57f   :  { %1062 = vmatpush1.bf16.msra.mxu0 %v1923_v32  ;;  %1103 = vmatpush1.bf16.msra.mxu1 %v1937_v36 }
 0x580   :  { %1179 = vmatprep.subr.bf16.mxu0 %v1637_v29  ;;  %1220 = vmatprep.subr.bf16.mxu1 %v1638_v12 }
 0x635   :  { %v949_v15 = vpop.f32.mrb[20].mxu0  ;;  %v990_v16 = vpop.f32.mrb[20].mxu1 }
 0x636   :  { %v997_v17 = vadd.f32 %v949_v15, %v910_v30  ;;  %v951_v18 = vpop.f32.mrb[21].mxu0  ;;  %v992_v33 = vpop.f32.mrb[21].mxu1  ;;  %v999_v23 = vadd.f32 %v990_v16, %v912_v21 }
 0x637   :  { %v998_v28 = vadd.f32 %v951_v18, %v911_v14  ;;  %v953_v6 = vpop.f32.mrb[22].mxu0  ;;  %v994_v34 = vpop.f32.mrb[22].mxu1  ;;  %v1000_v24 = vadd.f32 %v992_v33, %v913_v22 }
 0x638   :  { %v1407_v19 = vmul.f32 -1.442695, %v997_v17  ;;  %v954_v32 = vpop.f32.mrb[23].mxu0  ;;  %v995_v20 = vpop.f32.mrb[23].mxu1  ;;  %v1409_v26 = vmul.f32 -1.442695, %v999_v23 }
 0x639   :  { %v1408_v36 = vmul.f32 -1.442695, %v998_v28  ;;  %v1163_v21 = vpop.permute.xlu0 %1162 }
 0x63a   :  { %1566 = vpow2.f32 %v1407_v19  ;;  %vm1164_vm15 = vcmp.eq.s32.totalorder %v1163_v21, 1 }
 0x63b   :  { %1568 = vpow2.f32 %v1408_v36 }
 0x63c   :  { %1570 = vtanh.f32 %v1000_v24 }
 0x63d   :  { %1572 = vpow2.f32 %v1409_v26 }
 0x644   :  { %v1567_v39 = vpop.eup %1566 }
 0x645   :  { %v1010_v47 = vadd.f32 1.0, %v1567_v39  ;;  %v1569_v62 = vpop.eup %1568 }
 0x646   :  { %v1011_v63 = vadd.f32 1.0, %v1569_v62  ;;  %v1571_v27 = vpop.eup %1570 }
 0x647   :  { %1574 = vrcp.f32 %v1010_v47  ;;  %v1573_v35 = vpop.eup %1572 }
 0x648   :  { %1576 = vrcp.f32 %v1011_v63  ;;  %v1012_v25 = vadd.f32 1.0, %v1573_v35 }
 0x64a   :  { %1578 = vrcp.f32 %v1012_v25 }
 0x651   :  { %v1575_v41 = vpop.eup %1574 }
 0x652   :  { %v1021_v43 = vmul.f32 %v1575_v41, %v1571_v27  ;;  %v1577_v46 = vpop.eup %1576  ;;  %v1172_v41 = vld [vmem:[#allocation4 + $0x70] sm:$0xff] }
 0x653   :  { %v1020_v38 = vmul.f32 %v1577_v46, %v2167_v37  ;;  %v1175_v46 = vunpack.c.h.bf16 %v1172_v41 }
 0x654   :  { %v1579_v48 = vpop.eup %1578 }
 0x655   :  { %v1022_v42 = vadd.f32 %v1021_v43, %v1020_v38  ;;  %v1174_v43 = vunpack.c.l.bf16 %v1172_v41 }
 0x657   :  { %1580 = vtanh.f32 %v1022_v42  ;;  %v2254_v45 = vsel %vm1032_vm14, %v1022_v42, %v2167_v37  ;;  %v1640_v37 = vld [vmem:[#allocation7 + $0xcc] ss:$16 sps:$4 sm:$0xff]  }
 0x661   :  { %v1581_v29 = vpop.eup %1580 }
 0x662   :  { %v1024_v12 = vmul.f32 %v1581_v29, %v1579_v48  ;;  %v1173_v48 = vld [vmem:[#allocation4 + $0x78] sm:$0xff] }
 0x664   :  { %v1033_v13 = vsel %vm1032_vm14, %v1024_v12, 0.0  ;;  %v2257_v30 = vsel %vm1032_vm14, %v1024_v12, %v2170_v44  ;;  %v1641_v44 = vld [vmem:[#allocation7 + $0xc8] ss:$16 sps:$4 sm:$0xff]  }
 0x665   :  { %v1034_v14 = vpack.c.bf16 %v1033_v13, %v1033_v13  ;;  %v1046_v15 = vpack.c.bf16 %v2257_v30, %v2257_v30 }
 0x667   :  { %1036 = vst [vmem:[#allocation9 + $0x14] sm:$0xf] %v1034_v14  ;;  %1080 = vmatmul.mubr.bf16.vlgmr.msra.gmra.mrb[24].mxu0 %v1046_v15  ;;  %1121 = vmatmul.mubr.bf16.vlgmr.msra.gmra.mrb[24].mxu1 %v1046_v15 }
 0x668   :  { %1180 = vmatpush1.bf16.msra.mxu0 %v2174_v49  ;;  %1221 = vmatpush1.bf16.msra.mxu1 %v2177_v60  ;;  %v1642_v49 = vld [vmem:[#allocation7 + $0xe4] ss:$16 sps:$4 sm:$0xff]   ;;  %v1643_v60 = vld [vmem:[#allocation7 + $0xec] ss:$16 sps:$4 sm:$0xff]  }
 0x669   :  { %1181 = vmatprep.subr.bf16.mxu0 %v2180_v31  ;;  %1222 = vmatprep.subr.bf16.mxu1 %v2183_v50  ;;  %v1644_v31 = vld [vmem:[#allocation7 + $0xe0] ss:$16 sps:$4 sm:$0xff]   ;;  %v1645_v50 = vld [vmem:[#allocation7 + $0xe8] ss:$16 sps:$4 sm:$0xff]  }
 0x66a   :  { %1211 = vmatprep.mubr.bf16.mxu0 %v1768_v0  ;;  %1252 = vmatprep.mubr.bf16.mxu1 %v1768_v0  ;;  %v1639_v0 = vld [vmem:[#allocation7 + $0xa8] ss:$16 sps:$4 sm:$0xff]  }
 0x66c   :  { %1182 = vmatpush1.bf16.msra.mxu0 %v2188_v51  ;;  %1223 = vmatpush1.bf16.msra.mxu1 %v2191_v52  ;;  %v1040_v51 = vld [vmem:[#allocation4 + $0x60] sm:$0xff] }
 0x66d   :  { %1183 = vmatprep.subr.bf16.mxu0 %v2194_v53  ;;  %1224 = vmatprep.subr.bf16.mxu1 %v2197_v54  ;;  %v1042_v52 = vunpack.c.l.bf16 %v1040_v51  ;;  %v1043_v53 = vunpack.c.h.bf16 %v1040_v51 }
 0x670   :  { %1184 = vmatpush1.bf16.msra.mxu0 %v2200_v55  ;;  %1225 = vmatpush1.bf16.msra.mxu1 %v2203_v56 }
 0x671   :  { %1185 = vmatprep.subr.bf16.mxu0 %v2206_v57  ;;  %1226 = vmatprep.subr.bf16.mxu1 %v2209_v58 }
 0x674   :  { %1186 = vmatpush1.bf16.msra.mxu0 %v2212_v59  ;;  %1227 = vmatpush1.bf16.msra.mxu1 %v2215_v61  ;;  %v1041_v59 = vld [vmem:[#allocation4 + $0x68] sm:$0xff] }
 0x675   :  { %1187 = vmatprep.subr.bf16.mxu0 %v2218_v2  ;;  %1228 = vmatprep.subr.bf16.mxu1 %v2221_v3 }
 0x678   :  { %1188 = vmatpush1.bf16.msra.mxu0 %v2224_v4  ;;  %1229 = vmatpush1.bf16.msra.mxu1 %v2227_v5 }
 0x679   :  { %1189 = vmatprep.subr.bf16.mxu0 %v2230_v7  ;;  %1230 = vmatprep.subr.bf16.mxu1 %v2233_v8 }
 0x67c   :  { %1190 = vmatpush1.bf16.msra.mxu0 %v2236_v9  ;;  %1231 = vmatpush1.bf16.msra.mxu1 %v1639_v0  ;;  %v1044_v9 = vunpack.c.l.bf16 %v1041_v59 }
 0x67d   :  { %1191 = vmatprep.subr.bf16.mxu0 %v2240_v10  ;;  %1232 = vmatprep.subr.bf16.mxu1 %v1640_v37  ;;  %v1045_v10 = vunpack.c.h.bf16 %v1041_v59  ;;  %v1176_v37 = vunpack.c.l.bf16 %v1173_v48 }
 0x680   :  { %1192 = vmatpush1.bf16.msra.mxu0 %v2244_v11  ;;  %1233 = vmatpush1.bf16.msra.mxu1 %v1641_v44  ;;  %v1177_v44 = vunpack.c.h.bf16 %v1173_v48 }
 0x681   :  { %1193 = vmatprep.subr.bf16.mxu0 %v1642_v49  ;;  %1234 = vmatprep.subr.bf16.mxu1 %v1643_v60 }
 0x684   :  { %1194 = vmatpush1.bf16.msra.mxu0 %v1644_v31  ;;  %1235 = vmatpush1.bf16.msra.mxu1 %v1645_v50 }
 0x73a   :  { %v1081_v54 = vpop.f32.mrb[24].mxu0  ;;  %v1122_v55 = vpop.f32.mrb[24].mxu1 }
 0x73b   :  { %v1129_v56 = vadd.f32 %v1081_v54, %v1042_v52  ;;  %v1083_v57 = vpop.f32.mrb[25].mxu0  ;;  %v1124_v58 = vpop.f32.mrb[25].mxu1  ;;  %v1131_v11 = vadd.f32 %v1122_v55, %v1044_v9 }
 0x73c   :  { %v1130_v61 = vadd.f32 %v1083_v57, %v1043_v53  ;;  %v1085_v2 = vpop.f32.mrb[26].mxu0  ;;  %v1126_v3 = vpop.f32.mrb[26].mxu1  ;;  %v1132_v16 = vadd.f32 %v1124_v58, %v1045_v10 }
 0x73d   :  { %v1411_v4 = vmul.f32 -1.442695, %v1129_v56  ;;  %v1086_v5 = vpop.f32.mrb[27].mxu0  ;;  %v1127_v7 = vpop.f32.mrb[27].mxu1  ;;  %v1413_v17 = vmul.f32 -1.442695, %v1131_v11 }
 0x73e   :  { %v1412_v8 = vmul.f32 -1.442695, %v1130_v61  ;;  %v1295_v61 = vpop.permute.xlu1 %1294 }
 0x73f   :  { %1582 = vpow2.f32 %v1411_v4  ;;  %vm1296_vm0 = vcmp.eq.s32.totalorder %v1295_v61, 1 }
 0x740   :  { %1584 = vpow2.f32 %v1412_v8 }
 0x741   :  { %1586 = vtanh.f32 %v1132_v16 }
 0x742   :  { %1588 = vpow2.f32 %v1413_v17 }
 0x749   :  { %v1583_v18 = vpop.eup %1582 }
 0x74a   :  { %v1142_v33 = vadd.f32 1.0, %v1583_v18  ;;  %v1585_v1 = vpop.eup %1584 }
 0x74b   :  { %v1143_v28 = vadd.f32 1.0, %v1585_v1  ;;  %v1587_v6 = vpop.eup %1586 }
 0x74c   :  { %1590 = vrcp.f32 %v1142_v33  ;;  %v1589_v34 = vpop.eup %1588 }
 0x74d   :  { %1592 = vrcp.f32 %v1143_v28  ;;  %v1144_v36 = vadd.f32 1.0, %v1589_v34 }
 0x74f   :  { %1594 = vrcp.f32 %v1144_v36 }
 0x756   :  { %v1591_v19 = vpop.eup %1590 }
 0x757   :  { %v1153_v32 = vmul.f32 %v1591_v19, %v1587_v6  ;;  %v1593_v20 = vpop.eup %1592 }
 0x758   :  { %v1152_v22 = vmul.f32 %v1593_v20, %v2254_v45 }
 0x759   :  { %v1595_v26 = vpop.eup %1594 }
 0x75a   :  { %v1154_v23 = vadd.f32 %v1153_v32, %v1152_v22 }
 0x75c   :  { %1596 = vtanh.f32 %v1154_v23  ;;  %v1170_v24 = vsel %vm1164_vm15, %v1154_v23, %v2254_v45 }
 0x766   :  { %v1597_v39 = vpop.eup %1596 }
 0x767   :  { %v1156_v47 = vmul.f32 %v1597_v39, %v1595_v26 }
 0x769   :  { %v1165_v62 = vsel %vm1164_vm15, %v1156_v47, 0.0  ;;  %v2289_v63 = vsel %vm1164_vm15, %v1156_v47, %v2257_v30 }
 0x76a   :  { %v1166_v27 = vpack.c.bf16 %v1165_v62, %v1165_v62  ;;  %v1178_v35 = vpack.c.bf16 %v2289_v63, %v2289_v63 }
 0x76c   :  { %1168 = vst [vmem:[#allocation9 + $0x18] sm:$0xf] %v1166_v27  ;;  %1212 = vmatmul.mubr.bf16.vlgmr.msra.gmra.mrb[28].mxu0 %v1178_v35  ;;  %1253 = vmatmul.mubr.bf16.vlgmr.msra.gmra.mrb[28].mxu1 %v1178_v35 }
 0x83f   :  { %v1213_v25 = vpop.f32.mrb[28].mxu0  ;;  %v1254_v38 = vpop.f32.mrb[28].mxu1 }
 0x840   :  { %v1261_v40 = vadd.f32 %v1213_v25, %v1174_v43  ;;  %v1215_v42 = vpop.f32.mrb[29].mxu0  ;;  %v1256_v45 = vpop.f32.mrb[29].mxu1  ;;  %v1263_v49 = vadd.f32 %v1254_v38, %v1176_v37 }
 0x841   :  { %v1262_v29 = vadd.f32 %v1215_v42, %v1175_v46  ;;  %v1217_v12 = vpop.f32.mrb[30].mxu0  ;;  %v1258_v13 = vpop.f32.mrb[30].mxu1  ;;  %v1264_v60 = vadd.f32 %v1256_v45, %v1177_v44 }
 0x842   :  { %v1415_v30 = vmul.f32 -1.442695, %v1261_v40  ;;  %v1218_v14 = vpop.f32.mrb[31].mxu0  ;;  %v1259_v15 = vpop.f32.mrb[31].mxu1  ;;  %v1417_v31 = vmul.f32 -1.442695, %v1263_v49 }
 0x843   :  { %v1416_v0 = vmul.f32 -1.442695, %v1262_v29 }
 0x844   :  { %1598 = vpow2.f32 %v1415_v30 }
 0x845   :  { %1600 = vpow2.f32 %v1416_v0 }
 0x846   :  { %1602 = vtanh.f32 %v1264_v60 }
 0x847   :  { %1604 = vpow2.f32 %v1417_v31 }
 0x84e   :  { %v1599_v50 = vpop.eup %1598 }
 0x84f   :  { %v1274_v51 = vadd.f32 1.0, %v1599_v50  ;;  %v1601_v52 = vpop.eup %1600 }
 0x850   :  { %v1275_v53 = vadd.f32 1.0, %v1601_v52  ;;  %v1603_v54 = vpop.eup %1602 }
 0x851   :  { %1606 = vrcp.f32 %v1274_v51  ;;  %v1605_v55 = vpop.eup %1604 }
 0x852   :  { %1608 = vrcp.f32 %v1275_v53  ;;  %v1276_v59 = vadd.f32 1.0, %v1605_v55 }
 0x854   :  { %1610 = vrcp.f32 %v1276_v59 }
 0x85b   :  { %v1607_v56 = vpop.eup %1606 }
 0x85c   :  { %v1285_v57 = vmul.f32 %v1607_v56, %v1603_v54  ;;  %v1609_v58 = vpop.eup %1608 }
 0x85d   :  { %v1284_v2 = vmul.f32 %v1609_v58, %v1170_v24 }
 0x85e   :  { %v1611_v5 = vpop.eup %1610 }
 0x85f   :  { %v1286_v3 = vadd.f32 %v1285_v57, %v1284_v2 }
 0x861   :  { %1612 = vtanh.f32 %v1286_v3  ;;  %v1302_v4 = vsel %vm1296_vm0, %v1286_v3, %v1170_v24 }
 0x862   :  { %1309 = vst [vmem:[#allocation12] sm:$0xff] %v1302_v4 }
 0x86b   :  { %v1613_v7 = vpop.eup %1612 }
 0x86c   :  { %v1288_v8 = vmul.f32 %v1613_v7, %v1611_v5 }
 0x86e   :  { %v1297_v9 = vsel %vm1296_vm0, %v1288_v8, 0.0  ;;  %v1301_v10 = vsel %vm1296_vm0, %v1288_v8, %v2289_v63 }
 0x86f   :  { %v1298_v11 = vpack.c.bf16 %v1297_v9, %v1297_v9  ;;  %1308 = vst [vmem:[#allocation10] sm:$0xff] %v1301_v10 }
 0x870   :  { %1701 = shalt.err (!%p1698_p6)
}
 0x871   :  { %s1702_s27 = scalar_lea.hbm %s2351_s4, 128 }
 0x872   :  { %p1703_p7 = scmp.ne.s32.totalorder %s2351_s4, %s1702_s27  ;;  %p1706_p8 = scmp.lt.u32.totalorder %s1702_s27, %s2351_s4 }
 0x874   :  { %p1708_p9 = pnand %p1706_p8, %p1703_p7 }
 0x876   :  { %1711 = shalt.err (!%p1708_p9)
}
 0x877   :  { %1331 = dma.vmem_to_hbm [thread:$0]  %s1329_s19, 128, %s2351_s4, [#allocation11]   ;;  %1300 = vst [vmem:[#allocation9 + $0x1c] sm:$0xf] %v1298_v11 }
 0x878   :  { %s1712_s9 = scalar_lea.vmem %s2299_s23, 128  ;;  %p1717_p11 = scmp.lt.s32.totalorder %s2299_s23, %s2299_s23 }
 0x879   :  { %p1713_p10 = scmp.ne.s32.totalorder %s2299_s23, %s1712_s9  ;;  %p1718_p12 = scmp.lt.s32.totalorder %s1712_s9, %s1712_s9 }
 0x87b   :  { %p1719_p13 = por %p1718_p12, %p1717_p11 }
 0x87d   :  { %p1720_p0 = pnand %p1719_p13, %p1713_p10 }
 0x87f   :  { %1723 = shalt.err (!%p1720_p0)
}
 0x880   :  { %s1724_s12 = scalar_lea.hbm %s2352_s5, 128 }
 0x881   :  { %p1725_p1 = scmp.ne.s32.totalorder %s2352_s5, %s1724_s12  ;;  %p1728_p2 = scmp.lt.u32.totalorder %s1724_s12, %s2352_s5 }
 0x883   :  { %p1730_p3 = pnand %p1728_p2, %p1725_p1 }
 0x885   :  { %1733 = shalt.err (!%p1730_p3)
}
 0x886   :  { %1341 = dma.vmem_to_hbm [thread:$0]  %s2299_s23, 128, %s2352_s5, [#allocation11]  }
 0x887   :  { %s1734_s17 = scalar_lea.vmem %s2297_s21, 512  ;;  %p1739_p5 = scmp.lt.s32.totalorder %s2297_s21, %s2297_s21 }
 0x888   :  { %p1735_p4 = scmp.ne.s32.totalorder %s2297_s21, %s1734_s17  ;;  %p1740_p6 = scmp.lt.s32.totalorder %s1734_s17, %s1734_s17 }
 0x88a   :  { %p1741_p7 = por %p1740_p6, %p1739_p5 }
 0x88c   :  { %p1742_p8 = pnand %p1741_p7, %p1735_p4 }
 0x88e   :  { %1745 = shalt.err (!%p1742_p8)
}
 0x88f   :  { %s1746_s1 = scalar_lea.hbm %s2350_s3, 512 }
 0x890   :  { %p1747_p9 = scmp.ne.s32.totalorder %s2350_s3, %s1746_s1  ;;  %p1750_p10 = scmp.lt.u32.totalorder %s1746_s1, %s2350_s3 }
 0x892   :  { %p1752_p11 = pnand %p1750_p10, %p1747_p9 }
 0x894   :  { %1755 = shalt.err (!%p1752_p11)
}
 0x895   :  { %s1773_s5 = smov 64   ;;  %s1774_s23 = smov 4  }
 0x896   :  { %1321 = dma.vmem_to_hbm [thread:$0]  %s2297_s21, 512, %s2350_s3, [#allocation6], %s1773_s5, %s1773_s5, %s1774_s23  }
 0x897   :  { %1760 = dma.done.wait [#allocation6], 512  }
 0x898   :  { %1761 = vsyncadd [#allocation6], 4294966784 }
 0x899   :  { %1762 = dma.done.wait [#allocation11], 256  }
 0x89a   :  { %1763 = vsyncadd [#allocation11], 4294967040 }
 0x89b   :  { %1351 = vsyncpa [#allocation5], 1 }
 0x89c   :  { %1352 = vsyncpa [#allocation8], 1 }
 0x89d   :  { %1353 = vsyncpa [#allocation6], 1 }
 0x89e   :  { %1354 = vsyncpa [#allocation11], 1 }

</bundles_post_ra>
